<compile_context>
chip_gen: v7x
topology: tpu7x:2x2x1
jax: 0.10.0
libtpu: 0.0.40
codegen_flags: <defaults>
</compile_context>

<pallas_src>
import functools

import jax
import jax.numpy as jnp
from jax.experimental import pallas as pl
from jax.experimental.pallas import tpu as pltpu


def _taylor_exp_kernel(x_ref, o_ref):
    # x_ref: (TM, D) tile of rows; o_ref: (TM, 1 + D + D*D)
    x = x_ref[...]
    tm, d = x.shape
    # Fold the /2 into one operand: x_i * (0.5 * x_j) == (x_i * x_j) / 2 bitwise
    # (scaling by an exact power of two commutes with rounding).
    xh = x * jnp.asarray(0.5, dtype=x.dtype)
    # Second-order term: per-row outer product, flattened as index i*D + j.
    x2 = (x[:, :, None] * xh[:, None, :]).reshape(tm, d * d)
    ones = jnp.ones((tm, 1), dtype=x.dtype)
    o_ref[...] = jnp.concatenate([ones, x, x2], axis=-1)


def _round_up(a: int, b: int) -> int:
    return (a + b - 1) // b * b


@functools.partial(jax.jit, static_argnames=("block_rows",))
def taylor_exp(x: jax.Array, *, block_rows: int = 1024) -> jax.Array:
    """2nd-order Taylor feature map of exp(q^T k / sqrt(d)); matches TaylorExp.forward."""
    B, H, L, D = x.shape
    N = B * H * L
    out_dim = 1 + D + D * D
    dt = x.dtype
    itemsize = jnp.dtype(dt).itemsize

    xf = x.reshape(N, D)

    # --- Row-tile selection --------------------------------------------------
    # Sublane packing granularity: 8 rows for 32-bit dtypes, 16 for 16-bit.
    sub = 16 if itemsize < 4 else 8
    n_pad = _round_up(N, sub)
    tm = min(block_rows, n_pad)
    # Prefer >= 2 grid steps so both megacore TensorCores get work.
    if n_pad // tm < 2 and n_pad >= 2 * sub:
        tm = max(sub, _round_up(n_pad // 2, sub))
    Np = _round_up(N, tm)
    if Np != N:
        # Pad with zeros; padded rows produce finite values and are sliced off.
        xf = jnp.pad(xf, ((0, Np - N), (0, 0)))

    cost = pl.CostEstimate(
        flops=Np * D * D + Np * D,
        transcendentals=0,
        bytes_accessed=(Np * D + Np * out_dim) * itemsize,
    )

    out = pl.pallas_call(
        _taylor_exp_kernel,
        out_shape=jax.ShapeDtypeStruct((Np, out_dim), dt),
        grid=(Np // tm,),
        in_specs=[pl.BlockSpec((tm, D), lambda i: (i, 0))],
        out_specs=pl.BlockSpec((tm, out_dim), lambda i: (i, 0)),
        compiler_params=pltpu.CompilerParams(
            dimension_semantics=("parallel",),
            vmem_limit_bytes=48 * 1024 * 1024,
        ),
        cost_estimate=cost,
    )(xf)

    if Np != N:
        out = out[:N]
    return out.reshape(B, H, L, out_dim)


def taylor_exp_ref(x: jax.Array) -> jax.Array:
    """Pure-JAX reference mirroring the PyTorch forward exactly."""
    x2 = (x[..., :, None] * x[..., None, :]).reshape(*x.shape[:-1], -1) / 1.0
    return jnp.concatenate([x[..., :1] ** 0, x / 1.0, x2 / 2.0], axis=-1)


if __name__ == "__main__":
    key = jax.random.PRNGKey(0)
    B, H, L, D = 2, 4, 16, 16  # small, consistent with a linear-attention head
    x = jax.random.normal(key, (B, H, L, D), dtype=jnp.float32)

    out = jax.block_until_ready(taylor_exp(x))
    ref = taylor_exp_ref(x)
    assert out.shape == (B, H, L, 1 + D + D * D), out.shape
    assert jnp.allclose(out, ref, atol=1e-6, rtol=1e-6), "mismatch vs reference"

    # Awkward row count (B*H*L not a multiple of 8) — exercises the padding path.
    x_odd = jax.random.normal(jax.random.PRNGKey(1), (1, 1, 20, D), dtype=jnp.float32)
    out_odd = jax.block_until_ready(taylor_exp(x_odd))
    assert out_odd.shape == (1, 1, 20, 1 + D + D * D), out_odd.shape
    assert jnp.allclose(out_odd, taylor_exp_ref(x_odd), atol=1e-6, rtol=1e-6), (
        "mismatch vs reference (padded path)"
    )

    print("KERNEL_OK")
</pallas_src>

<mosaic_0001>
module attributes {stable_mosaic.version = 11 : i64} {
  func.func @_taylor_exp_kernel(%arg0: i32, %arg1: memref<64x16xf32, #tpu.memory_space<vmem>>, %arg2: memref<64x273xf32, #tpu.memory_space<vmem>>) attributes {dimension_semantics = [#tpu.dimension_semantics<parallel>], iteration_bounds = array<i64: 2>, scalar_prefetch = 0 : i64, scratch_operands = 0 : i64, tpu.core_type = #tpu.core_type<tc>, window_params = [{transform_indices = @transform_0, window_bounds = array<i64: 64, 16>}, {transform_indices = @transform_1, window_bounds = array<i64: 64, 273>}]} {
    %c0 = arith.constant 0 : index
    %c0_0 = arith.constant 0 : index
    %0 = vector.load %arg1[%c0, %c0_0] : memref<64x16xf32, #tpu.memory_space<vmem>>, vector<64x16xf32>
    %cst = arith.constant 5.000000e-01 : f32
    %1 = vector.broadcast %cst : f32 to vector<64x16xf32>
    %2 = arith.mulf %0, %1 : vector<64x16xf32>
    %3 = vector.shape_cast %0 : vector<64x16xf32> to vector<64x16x1xf32>
    %4 = vector.shape_cast %2 : vector<64x16xf32> to vector<64x1x16xf32>
    %5 = vector.broadcast %3 : vector<64x16x1xf32> to vector<64x16x16xf32>
    %6 = vector.broadcast %4 : vector<64x1x16xf32> to vector<64x16x16xf32>
    %7 = arith.mulf %5, %6 : vector<64x16x16xf32>
    %8 = vector.shape_cast %7 : vector<64x16x16xf32> to vector<64x256xf32>
    %cst_1 = arith.constant 1.000000e+00 : f32
    %9 = vector.broadcast %cst_1 : f32 to vector<64x1xf32>
    %10 = tpu.concatenate %9, %0, %8 in 1 : vector<64x1xf32>, vector<64x16xf32>, vector<64x256xf32> -> vector<64x273xf32>
    %c0_2 = arith.constant 0 : index
    %c0_3 = arith.constant 0 : index
    %11 = vector.load %arg2[%c0_2, %c0_3] : memref<64x273xf32, #tpu.memory_space<vmem>>, vector<64x273xf32>
    tpu.vector_store %arg2[%c0_2, %c0_3], %10 {strides = array<i32>} : memref<64x273xf32, #tpu.memory_space<vmem>>, vector<64x273xf32>,
    return
  }
  func.func @transform_0(%arg0: i32) -> (i32, i32) {
    %c0_i32 = arith.constant 0 : i32
    %c0_i32_0 = arith.constant 0 : i32
    return %arg0, %c0_i32 : i32, i32
  }
  func.func @transform_1(%arg0: i32) -> (i32, i32) {
    %c0_i32 = arith.constant 0 : i32
    %c0_i32_0 = arith.constant 0 : i32
    return %arg0, %c0_i32 : i32, i32
  }
}

</mosaic_0001>

<bundles_post_ra>
// kernel: taylor_exp.1
= control target key start
LH: loop header
LB: loop body
LE: loop exit
PB: predicated region body
PF: predicated region fallthrough
CT: control target
= control target key end

     0   :  { %6 = vsyncpa [#allocation3], 0  ;;  %s7540_s0 = inlined_call_operand.hbm [shape: f32[128,16], index: 0, kind: input, shape index: {}]   ;;  %s7541_s1 = inlined_call_operand.hbm [shape: f32[128,273], index: 1, kind: output, shape index: {}]  }
   0x1   :  { %8 = vsyncpa [#allocation3 + $0x1], 0 }
   0x2   :  { %9 = vsyncpa [#allocation4], 0 }
   0x3   :  { %11 = vsyncpa [#allocation4 + $0x1], 0  ;;  %s4902_s6 = smov 0   ;;  %s4904_s7 = smov 0  }
   0x4   :  { %s4906_s8 = smov 0   ;;  %s4908_s9 = smov 0  }
   0x5 LB: > { %s4923_s10 = sadd.s32 4294967295, %s4872_s9   ;;  %s4690_s11 = sadd.s32 4294967294, %s4872_s9   ;;  %s4872_s9 = sphi %s4908_s9, %s8059_s9   ;;  %s4868_s8 = sphi %s4906_s8, %s8058_s8   ;;  %s4864_s7 = sphi %s4904_s7, %s8057_s7   ;;  %s4860_s6 = sphi %s4902_s6, %s8056_s6  }
   0x6   : > { %s4927_s12 = sadd.s32 1, %s4872_s9   ;;  %s24_s13 = sadd.s32 1, %s4868_s8 }
   0x7   : > { %s21_s14 = ssub.s32 %s4872_s9, %s4927_s12  ;;  %p31_p0 = scmp.ne.s32.totalorder %s4868_s8, %s4864_s7 }
   0x8   : > { %p22_p1 = scmp.eq.s32.totalorder %s21_s14, 0  ;;  %p32_p2 = scmp.eq.s32.totalorder %s4872_s9, 0 }
   0x9   : > { %p37_p3 = scmp.ne.s32.totalorder %s4864_s7, %s4860_s6  ;;  %p38_p4 = scmp.eq.s32.totalorder %s4923_s10, 0 }
   0xa   : > { %s4939_s15 = scalar_select %p22_p1, %s4868_s8, %s24_s13  }
   0xb   : > { %p4941_p5 = por %p32_p2, %p31_p0  ;;  %p4945_p6 = por %p38_p4, %p37_p3 }
   0xc   : > { %p61_p7 = scmp.eq.s32.totalorder %s4923_s10, 1  ;;  %p67_p8 = scmp.eq.s32.totalorder %s4690_s11, 1 }
   0xd   : > { %p4718_p10 = scmp.lt.s32.totalorder %s4872_s9, 2  ;;  %s87_s20 = sand.u32 1, %s4868_s8  }
   0xe   : > { %p4952_p11 = por %p61_p7, %p31_p0  ;;  %p4956_p12 = por %p67_p8, %p37_p3 }
   0xf   : > { %s4703_s21 = sshll.u32 %s4872_s9, 10  ;;  %s4693_s22 = sshll.u32 %s87_s20, 6 }
  0x10   : > { %s7710_s18 = scalar_select %p4952_p11, 1, 0 }
  0x11   : > { %s7711_s19 = scalar_select %p4956_p12, 1, 0 }
  0x12   : > { %s4965_s25 = scalar_lea.hbm %s7540_s0, %s4703_s21  ;;  %s91_s26 = scalar_lea.vmem [#allocation2], %s4693_s22 }
  0x13   : > { %s98_s27 = sshll.u32 %s91_s26, 4  ;;  %p4969_p13 = pnand %p4718_p10, %p4941_p5  ;;  %s4973_s27 = int_to_ptr.vmem [resolvable:$true] %s98_s27 }
  0x14   : > { %s4975_s29 = scalar_lea.sflag [#allocation3], %s87_s20  ;;  %s4776_s30 = scalar_lea.hbm %s4965_s25, 1024 }
  0x15   : > { %p4777_p0 = scmp.ne.s32.totalorder %s4965_s25, %s4776_s30  ;;  %p4778_p1 = pneg %p4969_p13 }
  0x16   : > { %s4781_s4 = scalar_lea.hbm %s7540_s0, 2048  ;;  %p4782_p4 = scmp.lt.u32.totalorder %s4965_s25, %s7540_s0 }
  0x17   : > { %p4779_p2 = pnand %p4778_p1, %p4777_p0  ;;  %p4783_p5 = scmp.lt.u32.totalorder %s4781_s4, %s4776_s30 }
  0x18   : > { %p4785_p8 = scmp.lt.u32.totalorder %s4776_s30, %s4965_s25 }
  0x19   : > { %p4780_p3 = pneg %p4779_p2  ;;  %p4784_p7 = por %p4783_p5, %p4782_p4 }
  0x1b   : > { %p4786_p10 = por %p4785_p8, %p4784_p7 }
  0x1d   : > { %p4787_p9 = pnand %p4786_p10, %p4780_p3 }
  0x1f   : > { %4790 = shalt.err (!%p4787_p9)
}
  0x20   : > { %s4791_s13 = scalar_lea.vmem %s4973_s27, 1024  ;;  %s4874_s14 = smov [#allocation2]  }
  0x21   : > { %p4792_p0 = scmp.ne.s32.totalorder %s4973_s27, %s4791_s13  ;;  %s4796_s16 = sshll.u32 %s4874_s14, 4  ;;  %s4797_s16 = int_to_ptr.vmem [resolvable:$false] %s4796_s16 }
  0x22   : > { %s4798_s20 = scalar_lea.vmem %s4797_s16, 2048  ;;  %p4799_p11 = scmp.lt.s32.totalorder %s4973_s27, %s4797_s16 }
  0x23   : > { %p4794_p2 = pnand %p4792_p0, %p4778_p1  ;;  %p4800_p4 = scmp.lt.s32.totalorder %s4798_s20, %s4791_s13 }
  0x25   : > { %p4795_p12 = pneg %p4794_p2  ;;  %p4801_p5 = por %p4800_p4, %p4799_p11 }
  0x27   : > { %p4802_p7 = pnand %p4801_p5, %p4795_p12 }
  0x29   : > { %4805 = shalt.err (!%p4802_p7)
}
  0x2a   : > { %s4875_s21 = smov 128   ;;  %s4876_s22 = smov 8  }
  0x2b   : > { %4713 = dma.hbm_to_vmem [thread:$0]  (!%p4969_p13), %s4965_s25, 1024, %s4973_s27, %s4975_s29, %s4875_s21, %s4875_s21, %s4876_s22  }
  0x2c   : > { %p4696_p9 = scmp.ge.s32.totalorder %s4872_s9, 1  ;;  %p106_p1 = scmp.lt.s32.totalorder %s4872_s9, 3 }
  0x2e   : > { %p107_p3 = pnand %p4696_p9, %p106_p1 }
  0x30   : > { %110 = sbr.rel (%p107_p3) target bundleno = 914 (0x392), region = 24 }
  0x37   : > { %s5006_s23 = sand.u32 1, %s4864_s7  }
  0x38   : > { %s4697_s24 = sshll.u32 %s5006_s23, 6  ;;  %s113_s26 = scalar_lea.sflag [#allocation3], %s5006_s23 }
  0x39   : > { %s5010_s30 = scalar_lea.vmem [#allocation2], %s4697_s24 }
  0x3a   : > { %4851 = dma.done.wait (%p4945_p6), %s113_s26, 1024  }
  0x3b   : > { %4853 = vsyncadd (%p4945_p6), %s113_s26, 4294966272  ;;  %v153_v0 = vlaneseq  ;;  %v5025_v4 = vld [vmem:[%s5010_s30] sm:$0xff]  ;;  %v5062_v19 = vld [vmem:[%s5010_s30 + $0x8] sm:$0xff]  ;;  %v4877_v40 = vmov 1966171168   ;;  %s4880_s17 = smov 16  }
  0x3c   : > { %v5081_v28 = vld [vmem:[%s5010_s30 + $0x10] sm:$0xff]  ;;  %v5100_v37 = vld [vmem:[%s5010_s30 + $0x18] sm:$0xff]  ;;  %v867_v41 = vunpack.c.l.s4 %v4877_v40  ;;  %v145_v46 = vmul.f32 0.5, %v5025_v4  ;;  %v4878_v58 = vmov 1983009808   ;;  %s4881_s25 = smov 32  }
  0x3d   : > { %v5016_v1 = vshrl.u32 %v153_v0, 7  ;;  %v1708_v59 = vunpack.c.l.s4 %v4878_v58  ;;  %s4882_s27 = smov 48   ;;  %s4883_s28 = smov 64   ;;  %vm4329_vm0 = vcmask 130048   ;;  %vm4338_vm1 = vcmask 261120  }
  0x3e   : > { %v868_v43 = vunpack.c.0.s8 %v867_v41  ;;  %v865_v57 = vcombine.high %v145_v46, %v145_v46  ;;  %s4884_s29 = smov 80   ;;  %s4885_s2 = smov 96   ;;  %vm4347_vm2 = vcmask 392192   ;;  %vm4356_vm3 = vcmask 523264  }
  0x3f   : > { %v5019_v2 = vsub.s32 0, %v5016_v1  ;;  %v5022_v3 = vsub.s32 1, %v5016_v1  ;;  %v5032_v7 = vsub.s32 2, %v5016_v1  ;;  %v5037_v9 = vsub.s32 3, %v5016_v1  ;;  %s4886_s3 = smov 112   ;;  %s4887_s4 = smov 1  }
  0x40   : > { %v5042_v11 = vsub.s32 4, %v5016_v1  ;;  %v5047_v13 = vsub.s32 5, %v5016_v1  ;;  %v5052_v15 = vsub.s32 6, %v5016_v1  ;;  %v5057_v17 = vsub.s32 7, %v5016_v1  ;;  %s4888_s5 = smov 17   ;;  %s4704_s11 = smul.u32 192, %s5006_s23 }
  0x41   : > { %v167_v5 = vrot.slane %v5025_v4, %v5022_v3  ;;  %v156_v6 = vrot.slane %v5025_v4, %v5019_v2  ;;  %v178_v8 = vrot.slane %v5025_v4, %v5032_v7  ;;  %v189_v10 = vrot.slane %v5025_v4, %v5037_v9  ;;  %s4705_s14 = smul.u32 3072, %s4923_s10  ;;  %s4603_s10 = scalar_lea.sflag [#allocation4], %s5006_s23 }
  0x42   : > { %v200_v12 = vrot.slane %v5025_v4, %v5042_v11  ;;  %v211_v14 = vrot.slane %v5025_v4, %v5047_v13  ;;  %v222_v16 = vrot.slane %v5025_v4, %v5052_v15  ;;  %v233_v18 = vrot.slane %v5025_v4, %v5057_v17  ;;  %s7394_s13 = scalar_lea.vmem [#allocation5], %s4704_s11  ;;  %p8053_p11 = scmp.ne.s32.totalorder %s7710_s18, 0 }
  0x43   : > { %169 = vbcast.lane.b32.xlu1 %v167_v5, 256  ;;  %158 = vbcast.lane.b32.xlu0 %v156_v6, 256  ;;  %v244_v20 = vrot.slane %v5062_v19, %v5019_v2  ;;  %v255_v21 = vrot.slane %v5062_v19, %v5022_v3  ;;  %v266_v22 = vrot.slane %v5062_v19, %v5032_v7  ;;  %vm4365_vm4 = vcmask 654336   ;;  %s4617_s16 = sshll.u32 %s7394_s13, 4  ;;  %s7490_s22 = scalar_lea.hbm %s7541_s1, %s4705_s14  ;;  %s7492_s16 = int_to_ptr.vmem [resolvable:$true] %s4617_s16 }
  0x44   : > { %v277_v23 = vrot.slane %v5062_v19, %v5037_v9  ;;  %v288_v24 = vrot.slane %v5062_v19, %v5042_v11  ;;  %v299_v25 = vrot.slane %v5062_v19, %v5047_v13  ;;  %v310_v26 = vrot.slane %v5062_v19, %v5052_v15  ;;  %s4806_s24 = scalar_lea.vmem %s7492_s16, 3072  ;;  %s4889_s26 = smov [#allocation5]  }
  0x45   : > { %v321_v27 = vrot.slane %v5062_v19, %v5057_v17  ;;  %v332_v29 = vrot.slane %v5081_v28, %v5019_v2  ;;  %v343_v30 = vrot.slane %v5081_v28, %v5022_v3  ;;  %v354_v31 = vrot.slane %v5081_v28, %v5032_v7  ;;  %p4807_p6 = scmp.ne.s32.totalorder %s7492_s16, %s4806_s24 }
  0x46   : > { %v365_v32 = vrot.slane %v5081_v28, %v5037_v9  ;;  %v376_v33 = vrot.slane %v5081_v28, %v5042_v11  ;;  %v387_v34 = vrot.slane %v5081_v28, %v5047_v13  ;;  %v398_v35 = vrot.slane %v5081_v28, %v5052_v15 }
  0x47   : > { %173 = vbcast.lane.b32.xlu1 %v167_v5, 264  ;;  %162 = vbcast.lane.b32.xlu0 %v156_v6, 264  ;;  %v409_v36 = vrot.slane %v5081_v28, %v5057_v17  ;;  %v420_v38 = vrot.slane %v5100_v37, %v5019_v2  ;;  %v431_v39 = vrot.slane %v5100_v37, %v5022_v3  ;;  %v5128_v5 = vld [vmem:[%s5010_s30 + $0x20] sm:$0xff]  ;;  %vm4374_vm5 = vcmask 785408   ;;  %p4808_p12 = pnand %p4807_p6, %p8053_p11 }
  0x48   : > { %v442_v42 = vrot.slane %v5100_v37, %v5032_v7  ;;  %v453_v44 = vrot.slane %v5100_v37, %v5037_v9  ;;  %v5111_v45 = vsub.s32 %v868_v43, %v5016_v1  ;;  %v464_v47 = vrot.slane %v5100_v37, %v5042_v11 }
  0x49   : > { %v475_v50 = vrot.slane %v5100_v37, %v5047_v13  ;;  %v486_v56 = vrot.slane %v5100_v37, %v5052_v15  ;;  %v497_v0 = vrot.slane %v5100_v37, %v5057_v17  ;;  %v519_v41 = vrot.slane %v5128_v5, %v5022_v3  ;;  %p4809_p13 = pneg %p4808_p12 }
  0x4a   : > { %v872_v48 = vrot.slane %v145_v46, %v5111_v45  ;;  %v879_v6 = vrot.slane %v865_v57, %v5111_v45  ;;  %vm4383_vm6 = vcmask 916480   ;;  %vm4561_vm7 = vcmask 7168  }
  0x4b   : > { %184 = vbcast.lane.b32.xlu1 %v178_v8, 264  ;;  %180 = vbcast.lane.b32.xlu0 %v178_v8, 256  ;;  %v1709_v8 = vunpack.c.0.s8 %v1708_v59  ;;  %vm4528_vm8 = vcmask 138240  }
  0x4c   : > { %v880_v49 = vcombine.high %v872_v48, %v872_v48  ;;  %v888_v51 = vrot.slane %v872_v48, %v5111_v45 }
  0x4e   : > { %v910_v54 = vcombine.high %v888_v51, %v888_v51  ;;  %v902_v55 = vrot.slane %v880_v49, %v5111_v45  ;;  %v1260_v62 = vrot.slane %v888_v51, %v5019_v2 }
  0x4f   : > { %195 = vbcast.lane.b32.xlu1 %v189_v10, 264  ;;  %191 = vbcast.lane.b32.xlu0 %v189_v10, 256 }
  0x50   : > { %v1268_v63 = vrot.slane %v910_v54, %v5019_v2  ;;  %v912_v4 = vcombine.high %v902_v55, %v902_v55  ;;  %v1264_v10 = vrot.slane %v902_v55, %v5019_v2 }
  0x53   : > { %206 = vbcast.lane.b32.xlu1 %v200_v12, 264  ;;  %202 = vbcast.lane.b32.xlu0 %v200_v12, 256 }
  0x57   : > { %217 = vbcast.lane.b32.xlu1 %v211_v14, 264  ;;  %213 = vbcast.lane.b32.xlu0 %v211_v14, 256 }
  0x5b   : > { %228 = vbcast.lane.b32.xlu1 %v222_v16, 264  ;;  %224 = vbcast.lane.b32.xlu0 %v222_v16, 256 }
  0x5f   : > { %239 = vbcast.lane.b32.xlu1 %v233_v18, 264  ;;  %235 = vbcast.lane.b32.xlu0 %v233_v18, 256 }
  0x63   : > { %250 = vbcast.lane.b32.xlu1 %v244_v20, 264  ;;  %246 = vbcast.lane.b32.xlu0 %v244_v20, 256 }
  0x67   : > { %261 = vbcast.lane.b32.xlu1 %v255_v21, 264  ;;  %257 = vbcast.lane.b32.xlu0 %v255_v21, 256 }
  0x6b   : > { %272 = vbcast.lane.b32.xlu1 %v266_v22, 264  ;;  %268 = vbcast.lane.b32.xlu0 %v266_v22, 256  ;;  %v1272_v22 = vrot.slane %v912_v4, %v5019_v2 }
  0x6f   : > { %283 = vbcast.lane.b32.xlu1 %v277_v23, 264  ;;  %279 = vbcast.lane.b32.xlu0 %v277_v23, 256  ;;  %v508_v23 = vrot.slane %v5128_v5, %v5019_v2 }
  0x73   : > { %294 = vbcast.lane.b32.xlu1 %v288_v24, 264  ;;  %290 = vbcast.lane.b32.xlu0 %v288_v24, 256 }
  0x77   : > { %305 = vbcast.lane.b32.xlu1 %v299_v25, 264  ;;  %301 = vbcast.lane.b32.xlu0 %v299_v25, 256 }
  0x7b   : > { %316 = vbcast.lane.b32.xlu1 %v310_v26, 264  ;;  %312 = vbcast.lane.b32.xlu0 %v310_v26, 256 }
  0x7f   : > { %327 = vbcast.lane.b32.xlu1 %v321_v27, 264  ;;  %323 = vbcast.lane.b32.xlu0 %v321_v27, 256  ;;  %v895_v27 = vrot.slane %v879_v6, %v5111_v45 }
  0x81   : > { %v1276_v43 = vrot.slane %v895_v27, %v5019_v2  ;;  %v911_v46 = vcombine.high %v895_v27, %v895_v27 }
  0x83   : > { %338 = vbcast.lane.b32.xlu1 %v332_v29, 264  ;;  %334 = vbcast.lane.b32.xlu0 %v332_v29, 256 }
  0x87   : > { %349 = vbcast.lane.b32.xlu1 %v343_v30, 264  ;;  %345 = vbcast.lane.b32.xlu0 %v343_v30, 256 }
  0x8b   : > { %360 = vbcast.lane.b32.xlu1 %v354_v31, 264  ;;  %356 = vbcast.lane.b32.xlu0 %v354_v31, 256 }
  0x8f   : > { %371 = vbcast.lane.b32.xlu1 %v365_v32, 264  ;;  %367 = vbcast.lane.b32.xlu0 %v365_v32, 256 }
  0x93   : > { %382 = vbcast.lane.b32.xlu1 %v376_v33, 264  ;;  %378 = vbcast.lane.b32.xlu0 %v376_v33, 256  ;;  %v5137_v33 = vsub.s32 %v1709_v8, %v5016_v1 }
  0x97   : > { %393 = vbcast.lane.b32.xlu1 %v387_v34, 264  ;;  %389 = vbcast.lane.b32.xlu0 %v387_v34, 256  ;;  %v881_v34 = vcombine.high %v879_v6, %v879_v6 }
  0x99   : > { %v909_v54 = vrot.slane %v881_v34, %v5111_v45 }
  0x9b   : > { %404 = vbcast.lane.b32.xlu1 %v398_v35, 264  ;;  %400 = vbcast.lane.b32.xlu0 %v398_v35, 256  ;;  %v146_v35 = vmul.f32 0.5, %v5062_v19 }
  0x9d   : > { %v921_v55 = vrot.slane %v146_v35, %v5111_v45 }
  0x9f   : > { %415 = vbcast.lane.b32.xlu1 %v409_v36, 264  ;;  %411 = vbcast.lane.b32.xlu0 %v409_v36, 256  ;;  %v4879_v36 = vmov 1934713408  }
  0xa3   : > { %426 = vbcast.lane.b32.xlu1 %v420_v38, 264  ;;  %422 = vbcast.lane.b32.xlu0 %v420_v38, 256  ;;  %v1772_v38 = vunpack.c.l.s4 %v4879_v36  ;;  %v1280_v36 = vrot.slane %v909_v54, %v5019_v2 }
  0xa7   : > { %437 = vbcast.lane.b32.xlu1 %v431_v39, 264  ;;  %433 = vbcast.lane.b32.xlu0 %v431_v39, 256 }
  0xab   : > { %448 = vbcast.lane.b32.xlu1 %v442_v42, 264  ;;  %444 = vbcast.lane.b32.xlu0 %v442_v42, 256 }
  0xaf   : > { %459 = vbcast.lane.b32.xlu1 %v453_v44, 264  ;;  %455 = vbcast.lane.b32.xlu0 %v453_v44, 256  ;;  %v530_v44 = vrot.slane %v5128_v5, %v5032_v7 }
  0xb3   : > { %470 = vbcast.lane.b32.xlu1 %v464_v47, 264  ;;  %466 = vbcast.lane.b32.xlu0 %v464_v47, 256 }
  0xb5   : > { %v170_v52 = vpop.permute.xlu1 %169  ;;  %v159_v53 = vpop.permute.xlu0 %158 }
  0xb6   : > { %v1577_v16 = vmul.f32 %v1260_v62, %v159_v53  ;;  %v1579_v29 = vmul.f32 %v1264_v10, %v170_v52 }
  0xb7   : > { %481 = vbcast.lane.b32.xlu1 %v475_v50, 264  ;;  %477 = vbcast.lane.b32.xlu0 %v475_v50, 256 }
  0xb9   : > { %v174_v60 = vpop.permute.xlu1 %173  ;;  %v163_v61 = vpop.permute.xlu0 %162 }
  0xba   : > { %v1578_v18 = vmul.f32 %v1260_v62, %v163_v61  ;;  %v1580_v30 = vmul.f32 %v1264_v10, %v174_v60  ;;  %v1284_v62 = vrot.slane %v911_v46, %v5019_v2 }
  0xbb   : > { %492 = vbcast.lane.b32.xlu1 %v486_v56, 264  ;;  %488 = vbcast.lane.b32.xlu0 %v486_v56, 256 }
  0xbd   : > { %v185_v12 = vpop.permute.xlu1 %184  ;;  %v181_v14 = vpop.permute.xlu0 %180 }
  0xbe   : > { %v1582_v20 = vmul.f32 %v1268_v63, %v185_v12  ;;  %v1581_v21 = vmul.f32 %v1268_v63, %v181_v14  ;;  %v929_v63 = vcombine.high %v921_v55, %v921_v55 }
  0xbf   : > { %503 = vbcast.lane.b32.xlu1 %v497_v0, 264  ;;  %499 = vbcast.lane.b32.xlu0 %v497_v0, 256 }
  0xc0   : > { %v2793_v24 = vcombine.low %v1578_v18, %v1582_v20  ;;  %v2794_v25 = vcombine.high %v1578_v18, %v1582_v20  ;;  %v1706_v26 = vcombine.high %v1577_v16, %v1581_v21  ;;  %v1705_v42 = vcombine.low %v1577_v16, %v1581_v21 }
  0xc1   : > { %v196_v31 = vpop.permute.xlu1 %195  ;;  %v192_v32 = vpop.permute.xlu0 %191  ;;  %v914_v20 = vcombine.high %v146_v35, %v146_v35  ;;  %v541_v21 = vrot.slane %v5128_v5, %v5037_v9 }
  0xc2   : > { %v1584_v39 = vmul.f32 %v1272_v22, %v196_v31  ;;  %v1583_v40 = vmul.f32 %v1272_v22, %v192_v32  ;;  %v5146_v52 = vrot.slane %v2793_v24, %v5137_v33  ;;  %v5149_v53 = vrot.slane %v2794_v25, %v5137_v33 }
  0xc3   : > { %514 = vbcast.lane.b32.xlu1 %v508_v23, 264  ;;  %510 = vbcast.lane.b32.xlu0 %v508_v23, 256  ;;  %v5166_v60 = vrot.slane %v1705_v42, %v5137_v33  ;;  %v5169_v61 = vrot.slane %v1706_v26, %v5137_v33  ;;  %v913_v22 = vcombine.high %v909_v54, %v909_v54  ;;  %v1773_v24 = vunpack.c.0.s8 %v1772_v38 }
  0xc4   : > { %v2809_v47 = vcombine.low %v1580_v30, %v1584_v39  ;;  %v2810_v48 = vcombine.high %v1580_v30, %v1584_v39  ;;  %v1721_v49 = vcombine.low %v1579_v29, %v1583_v40  ;;  %v1722_v19 = vcombine.high %v1579_v29, %v1583_v40 }
  0xc5   : > { %v207_v50 = vpop.permute.xlu1 %206  ;;  %v203_v51 = vpop.permute.xlu0 %202  ;;  %v937_v23 = vrot.slane %v921_v55, %v5111_v45  ;;  %v951_v29 = vrot.slane %v929_v63, %v5111_v45  ;;  %v5191_v35 = vrot.slane %v914_v20, %v5111_v45  ;;  %v1288_v39 = vrot.slane %v913_v22, %v5019_v2 }
  0xc6   : > { %v5154_v56 = vrot.slane %v2809_v47, %v5137_v33  ;;  %v5157_v57 = vrot.slane %v2810_v48, %v5137_v33  ;;  %v5160_v58 = vrot.slane %v1721_v49, %v5137_v33  ;;  %v5163_v59 = vrot.slane %v1722_v19, %v5137_v33 }
  0xc7   : > { %525 = vbcast.lane.b32.xlu1 %v519_v41, 264  ;;  %521 = vbcast.lane.b32.xlu0 %v519_v41, 256  ;;  %v1586_v25 = vmul.f32 %v1276_v43, %v207_v50  ;;  %v959_v30 = vcombine.high %v937_v23, %v937_v23  ;;  %v1585_v31 = vmul.f32 %v1276_v43, %v203_v51  ;;  %v5207_v51 = vld [vmem:[%s5010_s30 + $0x28] sm:$0xff] }
  0xc8   : > { %v2857_v0 = vcombine.low %v5146_v52, %v5154_v56  ;;  %v2858_v4 = vcombine.high %v5146_v52, %v5154_v56  ;;  %v2873_v6 = vcombine.low %v5149_v53, %v5157_v57  ;;  %v1770_v14 = vcombine.high %v5166_v60, %v5160_v58 }
  0xc9   : > { %v218_v10 = vpop.permute.xlu1 %217  ;;  %v214_v12 = vpop.permute.xlu0 %213  ;;  %v1785_v16 = vcombine.low %v5169_v61, %v5163_v59  ;;  %v1786_v18 = vcombine.high %v5169_v61, %v5163_v59  ;;  %v552_v38 = vrot.slane %v5128_v5, %v5042_v11  ;;  %v961_v40 = vcombine.high %v951_v29, %v951_v29 }
  0xca   : > { %v5198_v41 = vsub.s32 %v1773_v24, %v5016_v1  ;;  %v1588_v46 = vmul.f32 %v1280_v36, %v218_v10  ;;  %v1292_v49 = vrot.slane %v937_v23, %v5019_v2  ;;  %v563_v19 = vrot.slane %v5128_v5, %v5047_v13 }
  0xcb   : > { %536 = vbcast.lane.b32.xlu1 %v530_v44, 264  ;;  %532 = vbcast.lane.b32.xlu0 %v530_v44, 256  ;;  %v5204_v50 = vrot.slane %v951_v29, %v5019_v2  ;;  %v574_v1 = vrot.slane %v5128_v5, %v5052_v15  ;;  %v1300_v54 = vrot.slane %v959_v30, %v5019_v2 }
  0xcc   : > { %v5214_v55 = vrot.slane %v5128_v5, %v5057_v17  ;;  %v1587_v63 = vmul.f32 %v1280_v36, %v214_v12  ;;  %v1769_v36 = vcombine.low %v5166_v60, %v5160_v58  ;;  %v629_v61 = vrot.slane %v5207_v51, %v5037_v9 }
  0xcd   : > { %v229_v26 = vpop.permute.xlu1 %228  ;;  %v225_v27 = vpop.permute.xlu0 %224 }
  0xce   : > { %v1590_v32 = vmul.f32 %v1284_v62, %v229_v26  ;;  %v1589_v34 = vmul.f32 %v1284_v62, %v225_v27  ;;  %v5218_v62 = vrot.slane %v5191_v35, %v5111_v45 }
  0xcf   : > { %547 = vbcast.lane.b32.xlu1 %v541_v21, 264  ;;  %543 = vbcast.lane.b32.xlu0 %v541_v21, 256  ;;  %v5221_v21 = vrot.slane %v961_v40, %v5019_v2 }
  0xd0   : > { %v2825_v42 = vcombine.low %v1586_v25, %v1590_v32  ;;  %v2826_v43 = vcombine.high %v1586_v25, %v1590_v32  ;;  %v1738_v44 = vcombine.high %v1585_v31, %v1589_v34  ;;  %v1737_v24 = vcombine.low %v1585_v31, %v1589_v34 }
  0xd1   : > { %v240_v47 = vpop.permute.xlu1 %239  ;;  %v236_v48 = vpop.permute.xlu0 %235  ;;  %v5229_v25 = vrot.slane %v5207_v51, %v5019_v2  ;;  %v930_v31 = vcombine.high %v5191_v35, %v5191_v35  ;;  %v5240_v34 = vmul.f32 0.5, %v5081_v28  ;;  %v5265_v28 = vrot.slane %v1769_v36, %v5198_v41 }
  0xd2   : > { %v1592_v10 = vmul.f32 %v1288_v39, %v240_v47  ;;  %v1591_v20 = vmul.f32 %v1288_v39, %v236_v48  ;;  %v2833_v22 = vrot.slane %v2825_v42, %v5137_v33  ;;  %v5225_v23 = vrot.slane %v2826_v43, %v5137_v33 }
  0xd3   : > { %558 = vbcast.lane.b32.xlu1 %v552_v38, 264  ;;  %554 = vbcast.lane.b32.xlu0 %v552_v38, 256  ;;  %v5235_v39 = vrot.slane %v5218_v62, %v5019_v2  ;;  %v1752_v47 = vrot.slane %v1738_v44, %v5137_v33  ;;  %v5252_v48 = vrot.slane %v5207_v51, %v5022_v3 }
  0xd4   : > { %v2841_v26 = vcombine.low %v1588_v46, %v1592_v10  ;;  %v2842_v27 = vcombine.high %v1588_v46, %v1592_v10  ;;  %v1753_v12 = vcombine.low %v1587_v63, %v1591_v20  ;;  %v1754_v29 = vcombine.high %v1587_v63, %v1591_v20  ;;  %7713 = vst [vmem:[#allocation8_spill] sm:$0xff] %v5265_v28 }
  0xd5   : > { %v251_v30 = vpop.permute.xlu1 %250  ;;  %v247_v32 = vpop.permute.xlu0 %246  ;;  %v1745_v46 = vrot.slane %v1737_v24, %v5137_v33  ;;  %v5262_v8 = vrot.slane %v5240_v34, %v5111_v45 }
  0xd6   : > { %v2849_v38 = vrot.slane %v2841_v26, %v5137_v33  ;;  %v5244_v40 = vrot.slane %v2842_v27, %v5137_v33  ;;  %v1761_v42 = vrot.slane %v1753_v12, %v5137_v33  ;;  %v1768_v43 = vrot.slane %v1754_v29, %v5137_v33 }
  0xd7   : > { %569 = vbcast.lane.b32.xlu1 %v563_v19, 264  ;;  %565 = vbcast.lane.b32.xlu0 %v563_v19, 256  ;;  %v1593_v58 = vmul.f32 %v1292_v49, %v247_v32  ;;  %v986_v59 = vrot.slane %v5262_v8, %v5111_v45 }
  0xd8   : > { %v2889_v63 = vcombine.low %v2833_v22, %v2849_v38  ;;  %v2890_v10 = vcombine.high %v2833_v22, %v2849_v38  ;;  %v2905_v20 = vcombine.low %v5225_v23, %v5244_v40  ;;  %v2906_v26 = vcombine.high %v5225_v23, %v5244_v40 }
  0xd9   : > { %v262_v27 = vpop.permute.xlu1 %261  ;;  %v258_v24 = vpop.permute.xlu0 %257  ;;  %v1801_v12 = vcombine.low %v1745_v46, %v1761_v42  ;;  %v1802_v44 = vcombine.high %v1745_v46, %v1761_v42  ;;  %v1817_v19 = vcombine.low %v1752_v47, %v1768_v43  ;;  %v1818_v29 = vcombine.high %v1752_v47, %v1768_v43 }
  0xda   : > { %v5271_v22 = vrot.slane %v1770_v14, %v5198_v41  ;;  %v5277_v38 = vrot.slane %v1785_v16, %v5198_v41  ;;  %v1594_v42 = vmul.f32 %v1292_v49, %v251_v30  ;;  %v5292_v16 = vrot.slane %v1786_v18, %v5198_v41 }
  0xdb   : > { %580 = vbcast.lane.b32.xlu1 %v574_v1, 264  ;;  %576 = vbcast.lane.b32.xlu0 %v574_v1, 256  ;;  %v5280_v43 = vrot.slane %v1801_v12, %v5198_v41  ;;  %v5283_v36 = vrot.slane %v1802_v44, %v5198_v41  ;;  %v5286_v46 = vrot.slane %v1817_v19, %v5198_v41 }
  0xdc   : > { %7714 = vst [vmem:[#allocation9_spill] sm:$0xff] %v5277_v38  ;;  %7717 = vst [vmem:[#allocation12_spill] sm:$0xff] %v5292_v16  ;;  %v5295_v1 = vrot.slane %v1818_v29, %v5198_v41  ;;  %v5298_v30 = vrot.slane %v2889_v63, %v5198_v41  ;;  %v5303_v49 = vrot.slane %v2890_v10, %v5198_v41 }
  0xdd   : > { %7715 = vst [vmem:[#allocation10_spill] sm:$0xff] %v5280_v43  ;;  %7716 = vst [vmem:[#allocation11_spill] sm:$0xff] %v5286_v46  ;;  %v273_v60 = vpop.permute.xlu1 %272  ;;  %v269_v14 = vpop.permute.xlu0 %268  ;;  %v5316_v10 = vrot.slane %v2905_v20, %v5198_v41  ;;  %v1596_v29 = vmul.f32 %v5204_v50, %v262_v27  ;;  %v5334_v27 = vrot.slane %v2858_v4, %v5198_v41 }
  0xde   : > { %7718 = vst [vmem:[#allocation13_spill] sm:$0xff] %v5295_v1  ;;  %7719 = vst [vmem:[#allocation14_spill] sm:$0xff] %v5298_v30  ;;  %v1598_v47 = vmul.f32 %v1300_v54, %v273_v60  ;;  %v1597_v12 = vmul.f32 %v1300_v54, %v269_v14  ;;  %v7725_v4 = vcombine.high %v5218_v62, %v5218_v62 }
  0xdf   : > { %7720 = vst [vmem:[#allocation15_spill] sm:$0xff] %v5303_v49  ;;  %591 = vbcast.lane.b32.xlu1 %v5214_v55, 264  ;;  %587 = vbcast.lane.b32.xlu0 %v5214_v55, 256  ;;  %7721 = vst [vmem:[#allocation16_spill] sm:$0xff] %v5316_v10  ;;  %v1595_v55 = vmul.f32 %v5204_v50, %v258_v24  ;;  %v5414_v52 = vrot.slane %v2906_v26, %v5198_v41 }
  0xe0   : > { %v2929_v32 = vcombine.low %v1594_v42, %v1598_v47  ;;  %v2930_v63 = vcombine.high %v1594_v42, %v1598_v47  ;;  %v1842_v19 = vcombine.high %v1593_v58, %v1597_v12  ;;  %v5327_v42 = vrot.slane %v2857_v0, %v5198_v41  ;;  %7723 = vst [vmem:[#allocation18_spill] sm:$0xff] %v5334_v27 }
  0xe1   : > { %v284_v60 = vpop.permute.xlu1 %283  ;;  %v280_v14 = vpop.permute.xlu0 %279  ;;  %v1841_v20 = vcombine.low %v1593_v58, %v1597_v12  ;;  %v5340_v47 = vrot.slane %v2873_v6, %v5198_v41  ;;  %v1316_v56 = vrot.slane %v7725_v4, %v5019_v2  ;;  %v963_v4 = vcombine.high %v5240_v34, %v5240_v34  ;;  %7726 = vst [vmem:[#allocation20_spill] sm:$0xff] %v5414_v52 }
  0xe2   : > { %7722 = vst [vmem:[#allocation17_spill] sm:$0xff] %v5327_v42  ;;  %v5343_v18 = vrot.slane %v2929_v32, %v5137_v33  ;;  %v5346_v0 = vrot.slane %v2930_v63, %v5137_v33  ;;  %v1600_v50 = vmul.f32 %v5221_v21, %v284_v60  ;;  %v1599_v24 = vmul.f32 %v5221_v21, %v280_v14 }
  0xe3   : > { %7724 = vst [vmem:[#allocation19_spill] sm:$0xff] %v5340_v47  ;;  %602 = vbcast.lane.b32.xlu1 %v5229_v25, 264  ;;  %598 = vbcast.lane.b32.xlu0 %v5229_v25, 256  ;;  %v958_v25 = vrot.slane %v930_v31, %v5111_v45  ;;  %v618_v14 = vrot.slane %v5207_v51, %v5032_v7 }
  0xe4   : > { %v2945_v58 = vcombine.low %v1596_v29, %v1600_v50  ;;  %v2946_v12 = vcombine.high %v1596_v29, %v1600_v50  ;;  %v1857_v32 = vcombine.low %v1595_v55, %v1599_v24  ;;  %v1858_v21 = vcombine.high %v1595_v55, %v1599_v24 }
  0xe5   : > { %v295_v63 = vpop.permute.xlu1 %294  ;;  %v291_v60 = vpop.permute.xlu0 %290  ;;  %v978_v29 = vcombine.high %v5262_v8, %v5262_v8  ;;  %v5386_v62 = vrot.slane %v1841_v20, %v5137_v33  ;;  %v5389_v24 = vrot.slane %v1842_v19, %v5137_v33  ;;  %v962_v54 = vcombine.high %v958_v25, %v958_v25 }
  0xe6   : > { %v5373_v55 = vrot.slane %v2945_v58, %v5137_v33  ;;  %v5376_v50 = vrot.slane %v2946_v12, %v5137_v33  ;;  %v5379_v35 = vrot.slane %v1857_v32, %v5137_v33  ;;  %v5382_v31 = vrot.slane %v1858_v21, %v5137_v33 }
  0xe7   : > { %613 = vbcast.lane.b32.xlu1 %v5252_v48, 264  ;;  %609 = vbcast.lane.b32.xlu0 %v5252_v48, 256  ;;  %v1000_v44 = vrot.slane %v978_v29, %v5111_v45  ;;  %v1602_v19 = vmul.f32 %v5235_v39, %v295_v63  ;;  %v1312_v20 = vrot.slane %v958_v25, %v5019_v2 }
  0xe8   : > { %v7727_v23 = vcombine.high %v5149_v53, %v5157_v57  ;;  %v1601_v26 = vmul.f32 %v5235_v39, %v291_v60  ;;  %v1008_v6 = vcombine.high %v986_v59, %v986_v59  ;;  %v977_v8 = vrot.slane %v963_v4, %v5111_v45 }
  0xe9   : > { %v306_v21 = vpop.permute.xlu1 %305  ;;  %v302_v48 = vpop.permute.xlu0 %301  ;;  %v1010_v58 = vcombine.high %v1000_v44, %v1000_v44  ;;  %v1320_v53 = vrot.slane %v962_v54, %v5019_v2  ;;  %v640_v57 = vrot.slane %v5207_v51, %v5042_v11  ;;  %v5439_v39 = vrot.slane %v986_v59, %v5019_v2 }
  0xea   : > { %v5427_v40 = vrot.slane %v7727_v23, %v5198_v41  ;;  %v5446_v23 = vld [vmem:[%s5010_s30 + $0x30] sm:$0xff]  ;;  %v5449_v34 = vrot.slane %v1000_v44, %v5019_v2  ;;  %v662_v59 = vrot.slane %v5207_v51, %v5052_v15  ;;  %v1332_v60 = vrot.slane %v1008_v6, %v5019_v2 }
  0xeb   : > { %624 = vbcast.lane.b32.xlu1 %v618_v14, 264  ;;  %620 = vbcast.lane.b32.xlu0 %v618_v14, 256  ;;  %v1604_v14 = vmul.f32 %v1312_v20, %v306_v21  ;;  %v979_v21 = vcombine.high %v977_v8, %v977_v8  ;;  %v1603_v52 = vmul.f32 %v1312_v20, %v302_v48 }
  0xec   : > { %7728 = vst [vmem:[#allocation21_spill] sm:$0xff] %v5427_v40  ;;  %v5466_v10 = vrot.slane %v5446_v23, %v5019_v2  ;;  %v1905_v6 = vcombine.low %v5386_v62, %v5379_v35  ;;  %v5480_v30 = vrot.slane %v5446_v23, %v5022_v3 }
  0xed   : > { %v317_v32 = vpop.permute.xlu1 %316  ;;  %v313_v12 = vpop.permute.xlu0 %312 }
  0xee   : > { %v1606_v29 = vmul.f32 %v1316_v56, %v317_v32  ;;  %v1605_v63 = vmul.f32 %v1316_v56, %v313_v12  ;;  %v651_v32 = vrot.slane %v5207_v51, %v5047_v13 }
  0xef   : > { %635 = vbcast.lane.b32.xlu1 %v629_v61, 264  ;;  %631 = vbcast.lane.b32.xlu0 %v629_v61, 256  ;;  %v5459_v61 = vrot.slane %v1010_v58, %v5019_v2 }
  0xf0   : > { %v2961_v4 = vcombine.low %v1602_v19, %v1606_v29  ;;  %v2962_v56 = vcombine.high %v1602_v19, %v1606_v29  ;;  %v1874_v12 = vcombine.high %v1601_v26, %v1605_v63  ;;  %v5456_v19 = vrot.slane %v5207_v51, %v5057_v17 }
  0xf1   : > { %v328_v54 = vpop.permute.xlu1 %327  ;;  %v324_v25 = vpop.permute.xlu0 %323  ;;  %v5462_v29 = vrot.slane %v977_v8, %v5111_v45  ;;  %v1873_v49 = vcombine.low %v1601_v26, %v1605_v63  ;;  %v5486_v26 = vmul.f32 0.5, %v5100_v37  ;;  %v7730_v37 = vcombine.high %v5386_v62, %v5379_v35 }
  0xf2   : > { %v1608_v40 = vmul.f32 %v1320_v53, %v328_v54  ;;  %v1607_v44 = vmul.f32 %v1320_v53, %v324_v25  ;;  %v2969_v47 = vrot.slane %v2961_v4, %v5137_v33  ;;  %v5472_v58 = vrot.slane %v2962_v56, %v5137_v33 }
  0xf3   : > { %646 = vbcast.lane.b32.xlu1 %v640_v57, 264  ;;  %642 = vbcast.lane.b32.xlu0 %v640_v57, 256  ;;  %v5476_v54 = vrot.slane %v5462_v29, %v5019_v2  ;;  %v5483_v4 = vrot.slane %v979_v21, %v5111_v45  ;;  %v1881_v57 = vrot.slane %v1873_v49, %v5137_v33 }
  0xf4   : > { %v2977_v27 = vcombine.low %v1604_v14, %v1608_v40  ;;  %v2978_v8 = vcombine.high %v1604_v14, %v1608_v40  ;;  %v1889_v20 = vcombine.low %v1603_v52, %v1607_v44  ;;  %v1890_v48 = vcombine.high %v1603_v52, %v1607_v44 }
  0xf5   : > { %v339_v25 = vpop.permute.xlu1 %338  ;;  %v335_v53 = vpop.permute.xlu0 %334  ;;  %v1888_v56 = vrot.slane %v1874_v12, %v5137_v33  ;;  %v5497_v21 = vrot.slane %v1905_v6, %v5198_v41  ;;  %v7731_v35 = vcombine.low %v5389_v24, %v5382_v31 }
  0xf6   : > { %v2985_v40 = vrot.slane %v2977_v27, %v5137_v33  ;;  %v5490_v52 = vrot.slane %v2978_v8, %v5137_v33  ;;  %v1897_v63 = vrot.slane %v1889_v20, %v5137_v33  ;;  %v1904_v14 = vrot.slane %v1890_v48, %v5137_v33 }
  0xf7   : > { %657 = vbcast.lane.b32.xlu1 %v651_v32, 264  ;;  %653 = vbcast.lane.b32.xlu0 %v651_v32, 256  ;;  %7729 = vst [vmem:[#allocation22_spill] sm:$0xff] %v5497_v21  ;;  %v5503_v27 = vrot.slane %v7730_v37, %v5198_v41  ;;  %v5513_v62 = vrot.slane %v7731_v35, %v5198_v41 }
  0xf8   : > { %v3025_v44 = vcombine.low %v2969_v47, %v2985_v40  ;;  %v3026_v8 = vcombine.high %v2969_v47, %v2985_v40  ;;  %v3041_v20 = vcombine.low %v5472_v58, %v5490_v52  ;;  %v1937_v32 = vcombine.low %v1881_v57, %v1897_v63 }
  0xf9   : > { %v350_v48 = vpop.permute.xlu1 %349  ;;  %v346_v12 = vpop.permute.xlu0 %345  ;;  %v1938_v42 = vcombine.high %v1881_v57, %v1897_v63  ;;  %v1953_v6 = vcombine.low %v1888_v56, %v1904_v14  ;;  %v1954_v1 = vcombine.high %v1888_v56, %v1904_v14  ;;  %7732 = vst [vmem:[#allocation23_spill] sm:$0xff] %v5513_v62  ;;  %v7733_v47 = vcombine.high %v5389_v24, %v5382_v31 }
  0xfa   : > { %v7735_v37 = vcombine.low %v5343_v18, %v5373_v55  ;;  %v7737_v14 = vcombine.high %v5343_v18, %v5373_v55  ;;  %v1610_v56 = vmul.f32 %v5439_v39, %v339_v25  ;;  %v5535_v35 = vrot.slane %v1937_v32, %v5198_v41 }
  0xfb   : > { %668 = vbcast.lane.b32.xlu1 %v662_v59, 264  ;;  %v5519_v40 = vrot.slane %v7733_v47, %v5198_v41  ;;  %664 = vbcast.lane.b32.xlu0 %v662_v59, 256  ;;  %v5538_v31 = vrot.slane %v1938_v42, %v5198_v41  ;;  %v5541_v24 = vrot.slane %v1953_v6, %v5198_v41 }
  0xfc   : > { %v5525_v63 = vrot.slane %v7735_v37, %v5198_v41  ;;  %v5531_v57 = vrot.slane %v7737_v14, %v5198_v41  ;;  %7739 = vst [vmem:[#allocation27_spill] sm:$0xff] %v5535_v35  ;;  %v1609_v47 = vmul.f32 %v5439_v39, %v335_v53  ;;  %v5545_v18 = vrot.slane %v1954_v1, %v5198_v41 }
  0xfd   : > { %7734 = vst [vmem:[#allocation24_spill] sm:$0xff] %v5519_v40  ;;  %7740 = vst [vmem:[#allocation28_spill] sm:$0xff] %v5538_v31  ;;  %v361_v37 = vpop.permute.xlu1 %360  ;;  %v357_v49 = vpop.permute.xlu0 %356  ;;  %v5548_v55 = vrot.slane %v3025_v44, %v5198_v41  ;;  %v7744_v59 = vcombine.low %v5346_v0, %v5376_v50  ;;  %v5559_v39 = vrot.slane %v3026_v8, %v5198_v41 }
  0xfe   : > { %7736 = vst [vmem:[#allocation25_spill] sm:$0xff] %v5525_v63  ;;  %7738 = vst [vmem:[#allocation26_spill] sm:$0xff] %v5531_v57  ;;  %v1614_v42 = vmul.f32 %v1332_v60, %v361_v37  ;;  %v1613_v32 = vmul.f32 %v1332_v60, %v357_v49  ;;  %v5572_v8 = vrot.slane %v3041_v20, %v5198_v41 }
  0xff   : > { %7741 = vst [vmem:[#allocation29_spill] sm:$0xff] %v5541_v24  ;;  %7742 = vst [vmem:[#allocation30_spill] sm:$0xff] %v5545_v18  ;;  %v5554_v25 = vrot.slane %v7744_v59, %v5198_v41  ;;  %679 = vbcast.lane.b32.xlu1 %v5456_v19, 264  ;;  %675 = vbcast.lane.b32.xlu0 %v5456_v19, 256  ;;  %v1612_v59 = vmul.f32 %v5449_v34, %v350_v48 }
 0x100   : > { %7743 = vst [vmem:[#allocation31_spill] sm:$0xff] %v5548_v55  ;;  %7746 = vst [vmem:[#allocation33_spill] sm:$0xff] %v5559_v39  ;;  %v3065_v49 = vcombine.low %v1610_v56, %v1614_v42  ;;  %v3066_v14 = vcombine.high %v1610_v56, %v1614_v42  ;;  %v1978_v37 = vcombine.high %v1609_v47, %v1613_v32 }
 0x101   : > { %7745 = vst [vmem:[#allocation32_spill] sm:$0xff] %v5554_v25  ;;  %7747 = vst [vmem:[#allocation34_spill] sm:$0xff] %v5572_v8  ;;  %v372_v6 = vpop.permute.xlu1 %371  ;;  %v368_v1 = vpop.permute.xlu0 %367  ;;  %v706_v53 = vrot.slane %v5446_v23, %v5032_v7  ;;  %v1611_v56 = vmul.f32 %v5449_v34, %v346_v12  ;;  %v1977_v42 = vcombine.low %v1609_v47, %v1613_v32 }
 0x102   : > { %v1009_v19 = vcombine.high %v5462_v29, %v5462_v29  ;;  %v1019_v20 = vrot.slane %v5486_v26, %v5111_v45  ;;  %v5587_v48 = vrot.slane %v3065_v49, %v5137_v33  ;;  %v5590_v16 = vrot.slane %v3066_v14, %v5137_v33 }
 0x103   : > { %v1616_v44 = vmul.f32 %v5459_v61, %v372_v6  ;;  %v1615_v24 = vmul.f32 %v5459_v61, %v368_v1  ;;  %690 = vbcast.lane.b32.xlu1 %v5466_v10, 264  ;;  %686 = vbcast.lane.b32.xlu0 %v5466_v10, 256  ;;  %v1011_v34 = vcombine.high %v5483_v4, %v5483_v4 }
 0x104   : > { %v1348_v10 = vrot.slane %v1009_v19, %v5019_v2  ;;  %v1027_v60 = vcombine.high %v1019_v20, %v1019_v20  ;;  %v1012_v29 = vcombine.high %v5486_v26, %v5486_v26  ;;  %v7748_v19 = vcombine.high %v5346_v0, %v5376_v50 }
 0x105   : > { %v3081_v32 = vcombine.low %v1612_v59, %v1616_v44  ;;  %v3082_v6 = vcombine.high %v1612_v59, %v1616_v44  ;;  %v1993_v49 = vcombine.low %v1611_v56, %v1615_v24  ;;  %v1994_v61 = vcombine.high %v1611_v56, %v1615_v24  ;;  %v383_v1 = vpop.permute.xlu1 %382  ;;  %v379_v14 = vpop.permute.xlu0 %378 }
 0x106   : > { %v5623_v59 = vrot.slane %v1977_v42, %v5137_v33  ;;  %v5626_v56 = vrot.slane %v1978_v37, %v5137_v33  ;;  %v1035_v37 = vrot.slane %v1019_v20, %v5111_v45  ;;  %v1026_v26 = vrot.slane %v1012_v29, %v5111_v45 }
 0x107   : > { %v5610_v12 = vrot.slane %v3081_v32, %v5137_v33  ;;  %v5613_v47 = vrot.slane %v3082_v6, %v5137_v33  ;;  %v5616_v44 = vrot.slane %v1993_v49, %v5137_v33  ;;  %v5619_v24 = vrot.slane %v1994_v61, %v5137_v33  ;;  %701 = vbcast.lane.b32.xlu1 %v5480_v30, 264 }
 0x108   : > { %697 = vbcast.lane.b32.xlu0 %v5480_v30, 256  ;;  %v5635_v32 = vrot.slane %v7748_v19, %v5198_v41  ;;  %v7750_v19 = vcombine.high %v5472_v58, %v5490_v52  ;;  %v717_v30 = vrot.slane %v5446_v23, %v5037_v9  ;;  %v1049_v6 = vrot.slane %v1027_v60, %v5111_v45 }
 0x109   : > { %v394_v49 = vpop.permute.xlu1 %393  ;;  %v390_v61 = vpop.permute.xlu0 %389  ;;  %v1618_v0 = vmul.f32 %v5476_v54, %v383_v1  ;;  %v1344_v50 = vrot.slane %v5483_v4, %v5019_v2  ;;  %v1352_v58 = vrot.slane %v1011_v34, %v5019_v2  ;;  %v728_v8 = vrot.slane %v5446_v23, %v5042_v11 }
 0x10a   : > { %7749 = vst [vmem:[#allocation35_spill] sm:$0xff] %v5635_v32  ;;  %v5655_v42 = vrot.slane %v7750_v19, %v5198_v41  ;;  %v1057_v25 = vcombine.high %v1035_v37, %v1035_v37  ;;  %v1059_v20 = vcombine.high %v1049_v6, %v1049_v6  ;;  %v1028_v39 = vcombine.high %v1026_v26, %v1026_v26 }
 0x10b   : > { %712 = vbcast.lane.b32.xlu1 %v706_v53, 264  ;;  %v1617_v60 = vmul.f32 %v5476_v54, %v379_v14  ;;  %v5672_v4 = vrot.slane %v1035_v37, %v5019_v2  ;;  %v5678_v34 = vrot.slane %v1026_v26, %v5111_v45  ;;  %v1620_v37 = vmul.f32 %v1344_v50, %v394_v49 }
 0x10c   : > { %7751 = vst [vmem:[#allocation36_spill] sm:$0xff] %v5655_v42  ;;  %708 = vbcast.lane.b32.xlu0 %v706_v53, 256  ;;  %v5675_v53 = vld [vmem:[%s5010_s30 + $0x38] sm:$0xff]  ;;  %v5687_v62 = vrot.slane %v1049_v6, %v5019_v2  ;;  %v750_v26 = vrot.slane %v5446_v23, %v5052_v15  ;;  %v1364_v18 = vrot.slane %v1057_v25, %v5019_v2 }
 0x10d   : > { %v405_v52 = vpop.permute.xlu1 %404  ;;  %v401_v19 = vpop.permute.xlu0 %400  ;;  %v5694_v54 = vrot.slane %v5446_v23, %v5057_v17  ;;  %v5701_v49 = vrot.slane %v5675_v53, %v5019_v2  ;;  %v1619_v6 = vmul.f32 %v1344_v50, %v390_v61  ;;  %v5708_v25 = vrot.slane %v5678_v34, %v5019_v2 }
 0x10e   : > { %v1622_v29 = vmul.f32 %v1348_v10, %v405_v52  ;;  %v1621_v57 = vmul.f32 %v1348_v10, %v401_v19  ;;  %v739_v19 = vrot.slane %v5446_v23, %v5047_v13  ;;  %v2041_v32 = vcombine.low %v5623_v59, %v5616_v44 }
 0x10f   : > { %723 = vbcast.lane.b32.xlu1 %v717_v30, 264 }
 0x110   : > { %v3097_v14 = vcombine.low %v1618_v0, %v1622_v29  ;;  %v3098_v10 = vcombine.high %v1618_v0, %v1622_v29  ;;  %v2010_v52 = vcombine.high %v1617_v60, %v1621_v57  ;;  %719 = vbcast.lane.b32.xlu0 %v717_v30, 256  ;;  %v5697_v30 = vrot.slane %v1059_v20, %v5019_v2 }
 0x111   : > { %v416_v1 = vpop.permute.xlu1 %415  ;;  %v412_v40 = vpop.permute.xlu0 %411  ;;  %v5704_v0 = vrot.slane %v1028_v39, %v5111_v45  ;;  %v2009_v63 = vcombine.low %v1617_v60, %v1621_v57  ;;  %v5727_v57 = vmul.f32 0.5, %v5128_v5  ;;  %v7753_v5 = vcombine.high %v5623_v59, %v5616_v44 }
 0x112   : > { %v1624_v29 = vmul.f32 %v1352_v58, %v416_v1  ;;  %v1623_v42 = vmul.f32 %v1352_v58, %v412_v40  ;;  %v3105_v20 = vrot.slane %v3097_v14, %v5137_v33  ;;  %v5714_v55 = vrot.slane %v3098_v10, %v5137_v33 }
 0x113   : > { %734 = vbcast.lane.b32.xlu1 %v728_v8, 264  ;;  %v5718_v1 = vrot.slane %v5675_v53, %v5022_v3  ;;  %v5722_v38 = vrot.slane %v5704_v0, %v5019_v2  ;;  %v1058_v14 = vcombine.high %v5678_v34, %v5678_v34  ;;  %v2017_v10 = vrot.slane %v2009_v63, %v5137_v33 }
 0x114   : > { %730 = vbcast.lane.b32.xlu0 %v728_v8, 256  ;;  %v3113_v39 = vcombine.low %v1620_v37, %v1624_v29  ;;  %v3114_v46 = vcombine.high %v1620_v37, %v1624_v29  ;;  %v2025_v61 = vcombine.low %v1619_v6, %v1623_v42  ;;  %v2026_v50 = vcombine.high %v1619_v6, %v1623_v42 }
 0x115   : > { %v427_v40 = vpop.permute.xlu1 %426  ;;  %v423_v58 = vpop.permute.xlu0 %422  ;;  %v2024_v37 = vrot.slane %v2010_v52, %v5137_v33  ;;  %v5738_v34 = vrot.slane %v2041_v32, %v5198_v41  ;;  %v5744_v6 = vrot.slane %v7753_v5, %v5198_v41  ;;  %v7754_v44 = vcombine.low %v5626_v56, %v5619_v24 }
 0x116   : > { %v3121_v8 = vrot.slane %v3113_v39, %v5137_v33  ;;  %v5731_v42 = vrot.slane %v3114_v46, %v5137_v33  ;;  %v2033_v60 = vrot.slane %v2025_v61, %v5137_v33  ;;  %v2040_v3 = vrot.slane %v2026_v50, %v5137_v33 }
 0x117   : > { %745 = vbcast.lane.b32.xlu1 %v739_v19, 264  ;;  %7752 = vst [vmem:[#allocation37_spill] sm:$0xff] %v5738_v34  ;;  %v5754_v59 = vrot.slane %v7754_v44, %v5198_v41  ;;  %v7756_v5 = vcombine.low %v5587_v48, %v5610_v12 }
 0x118   : > { %741 = vbcast.lane.b32.xlu0 %v739_v19, 256  ;;  %v3161_v46 = vcombine.low %v3105_v20, %v3121_v8  ;;  %v3162_v29 = vcombine.high %v3105_v20, %v3121_v8  ;;  %v3177_v39 = vcombine.low %v5714_v55, %v5731_v42  ;;  %v2073_v19 = vcombine.low %v2017_v10, %v2033_v60 }
 0x119   : > { %v438_v61 = vpop.permute.xlu1 %437  ;;  %v434_v52 = vpop.permute.xlu0 %433  ;;  %v2074_v50 = vcombine.high %v2017_v10, %v2033_v60  ;;  %v2089_v32 = vcombine.low %v2024_v37, %v2040_v3  ;;  %v2090_v31 = vcombine.high %v2024_v37, %v2040_v3  ;;  %v7755_v20 = vcombine.high %v5626_v56, %v5619_v24 }
 0x11a   : > { %v5766_v60 = vrot.slane %v7756_v5, %v5198_v41  ;;  %v7758_v3 = vcombine.high %v5587_v48, %v5610_v12  ;;  %v1626_v37 = vmul.f32 %v5672_v4, %v427_v40  ;;  %v5776_v44 = vrot.slane %v2073_v19, %v5198_v41 }
 0x11b   : > { %756 = vbcast.lane.b32.xlu1 %v750_v26, 264  ;;  %v5760_v8 = vrot.slane %v7755_v20, %v5198_v41  ;;  %v5779_v24 = vrot.slane %v2074_v50, %v5198_v41  ;;  %v5782_v56 = vrot.slane %v2089_v32, %v5198_v41  ;;  %v1625_v20 = vmul.f32 %v5672_v4, %v423_v58 }
 0x11c   : > { %7757 = vst [vmem:[#allocation38_spill] sm:$0xff] %v5766_v60  ;;  %v5772_v10 = vrot.slane %v7758_v3, %v5198_v41  ;;  %752 = vbcast.lane.b32.xlu0 %v750_v26, 256  ;;  %7760 = vst [vmem:[#allocation40_spill] sm:$0xff] %v5776_v44  ;;  %v5786_v48 = vrot.slane %v2090_v31, %v5198_v41  ;;  %v5789_v12 = vrot.slane %v3161_v46, %v5198_v41 }
 0x11d   : > { %7761 = vst [vmem:[#allocation41_spill] sm:$0xff] %v5782_v56  ;;  %v449_v5 = vpop.permute.xlu1 %448  ;;  %v445_v63 = vpop.permute.xlu0 %444  ;;  %v7763_v26 = vcombine.low %v5590_v16, %v5613_v47  ;;  %v5800_v4 = vrot.slane %v3162_v29, %v5198_v41  ;;  %v5813_v29 = vrot.slane %v3177_v39, %v5198_v41  ;;  %v794_v58 = vrot.slane %v5675_v53, %v5032_v7 }
 0x11e   : > { %7759 = vst [vmem:[#allocation39_spill] sm:$0xff] %v5772_v10  ;;  %7762 = vst [vmem:[#allocation42_spill] sm:$0xff] %v5789_v12  ;;  %v1630_v19 = vmul.f32 %v1364_v18, %v449_v5  ;;  %v1629_v50 = vmul.f32 %v1364_v18, %v445_v63  ;;  %v1068_v39 = vrot.slane %v5727_v57, %v5111_v45 }
 0x11f   : > { %v5795_v40 = vrot.slane %v7763_v26, %v5198_v41  ;;  %7765 = vst [vmem:[#allocation44_spill] sm:$0xff] %v5800_v4  ;;  %767 = vbcast.lane.b32.xlu1 %v5694_v54, 264  ;;  %7766 = vst [vmem:[#allocation45_spill] sm:$0xff] %v5813_v29  ;;  %v1628_v26 = vmul.f32 %v5687_v62, %v438_v61 }
 0x120   : > { %v3201_v63 = vcombine.low %v1626_v37, %v1630_v19  ;;  %v3202_v3 = vcombine.high %v1626_v37, %v1630_v19  ;;  %v2114_v5 = vcombine.high %v1625_v20, %v1629_v50  ;;  %763 = vbcast.lane.b32.xlu0 %v5694_v54, 256  ;;  %v1627_v37 = vmul.f32 %v5687_v62, %v434_v52 }
 0x121   : > { %7764 = vst [vmem:[#allocation43_spill] sm:$0xff] %v5795_v40  ;;  %v460_v31 = vpop.permute.xlu1 %459  ;;  %v456_v32 = vpop.permute.xlu0 %455  ;;  %v2113_v19 = vcombine.low %v1625_v20, %v1629_v50  ;;  %v1380_v54 = vrot.slane %v1058_v14, %v5019_v2  ;;  %v1084_v62 = vrot.slane %v1068_v39, %v5111_v45  ;;  %v1076_v18 = vcombine.high %v1068_v39, %v1068_v39 }
 0x122   : > { %v5827_v61 = vrot.slane %v3201_v63, %v5137_v33  ;;  %v5830_v56 = vrot.slane %v3202_v3, %v5137_v33  ;;  %v1632_v7 = vmul.f32 %v5697_v30, %v460_v31  ;;  %v1631_v46 = vmul.f32 %v5697_v30, %v456_v32 }
 0x123   : > { %778 = vbcast.lane.b32.xlu1 %v5701_v49, 264  ;;  %v1061_v14 = vcombine.high %v5727_v57, %v5727_v57  ;;  %v7767_v39 = vcombine.high %v5590_v16, %v5613_v47 }
 0x124   : > { %774 = vbcast.lane.b32.xlu0 %v5701_v49, 256  ;;  %v3217_v50 = vcombine.low %v1628_v26, %v1632_v7  ;;  %v3218_v31 = vcombine.high %v1628_v26, %v1632_v7  ;;  %v2129_v63 = vcombine.low %v1627_v37, %v1631_v46  ;;  %v2130_v30 = vcombine.high %v1627_v37, %v1631_v46 }
 0x125   : > { %v471_v32 = vpop.permute.xlu1 %470  ;;  %v467_v3 = vpop.permute.xlu0 %466  ;;  %v1060_v49 = vcombine.high %v5704_v0, %v5704_v0  ;;  %v5863_v0 = vrot.slane %v2113_v19, %v5137_v33  ;;  %v5866_v37 = vrot.slane %v2114_v5, %v5137_v33  ;;  %v5875_v7 = vrot.slane %v7767_v39, %v5198_v41 }
 0x126   : > { %v5850_v52 = vrot.slane %v3217_v50, %v5137_v33  ;;  %v5853_v20 = vrot.slane %v3218_v31, %v5137_v33  ;;  %v5856_v26 = vrot.slane %v2129_v63, %v5137_v33  ;;  %v5859_v46 = vrot.slane %v2130_v30, %v5137_v33 }
 0x127   : > { %789 = vbcast.lane.b32.xlu1 %v5718_v1, 264  ;;  %7768 = vst [vmem:[#allocation46_spill] sm:$0xff] %v5875_v7  ;;  %v7769_v39 = vcombine.high %v5714_v55, %v5731_v42  ;;  %v1384_v5 = vrot.slane %v1060_v49, %v5019_v2  ;;  %v1098_v19 = vrot.slane %v1076_v18, %v5111_v45  ;;  %v5910_v18 = vmul.f32 0.5, %v5207_v51 }
 0x128   : > { %785 = vbcast.lane.b32.xlu0 %v5718_v1, 256  ;;  %v2178_v30 = vcombine.high %v5863_v0, %v5856_v26  ;;  %v2193_v16 = vcombine.low %v5866_v37, %v5859_v46  ;;  %v2194_v47 = vcombine.high %v5866_v37, %v5859_v46  ;;  %v805_v1 = vrot.slane %v5675_v53, %v5037_v9 }
 0x129   : > { %v482_v31 = vpop.permute.xlu1 %481  ;;  %v478_v63 = vpop.permute.xlu0 %477  ;;  %v5895_v57 = vrot.slane %v7769_v39, %v5198_v41  ;;  %v1075_v50 = vrot.slane %v1061_v14, %v5111_v45  ;;  %v1634_v29 = vmul.f32 %v5708_v25, %v471_v32  ;;  %v816_v46 = vrot.slane %v5675_v53, %v5042_v11 }
 0x12a   : > { %v5906_v55 = vrot.slane %v1084_v62, %v5019_v2  ;;  %v1106_v42 = vcombine.high %v1084_v62, %v1084_v62  ;;  %v1633_v37 = vmul.f32 %v5708_v25, %v467_v3  ;;  %v1108_v40 = vcombine.high %v1098_v19, %v1098_v19 }
 0x12b   : > { %7770 = vst [vmem:[#allocation47_spill] sm:$0xff] %v5895_v57  ;;  %800 = vbcast.lane.b32.xlu1 %v794_v58, 264  ;;  %v1077_v49 = vcombine.high %v1075_v50, %v1075_v50  ;;  %v2177_v62 = vcombine.low %v5863_v0, %v5856_v26  ;;  %v827_v25 = vrot.slane %v5675_v53, %v5047_v13 }
 0x12c   : > { %796 = vbcast.lane.b32.xlu0 %v794_v58, 256  ;;  %v5921_v32 = vrot.slane %v1098_v19, %v5019_v2  ;;  %v1636_v11 = vmul.f32 %v5722_v38, %v482_v31  ;;  %v5929_v58 = vrot.slane %v1106_v42, %v5019_v2  ;;  %v5933_v13 = vrot.slane %v5675_v53, %v5057_v17 }
 0x12d   : > { %v493_v39 = vpop.permute.xlu1 %492  ;;  %v489_v9 = vpop.permute.xlu0 %488  ;;  %v5936_v19 = vrot.slane %v1108_v40, %v5019_v2  ;;  %v5948_v31 = vrot.slane %v5910_v18, %v5111_v45  ;;  %v1635_v42 = vmul.f32 %v5722_v38, %v478_v63  ;;  %v5952_v40 = vrot.slane %v2177_v62, %v5198_v41 }
 0x12e   : > { %v1638_v14 = vmul.f32 %v1380_v54, %v493_v39  ;;  %v1637_v4 = vmul.f32 %v1380_v54, %v489_v9  ;;  %v838_v9 = vrot.slane %v5675_v53, %v5052_v15  ;;  %v5944_v15 = vrot.slane %v1077_v49, %v5111_v45 }
 0x12f   : > { %811 = vbcast.lane.b32.xlu1 %v805_v1, 264  ;;  %7771 = vst [vmem:[#allocation48_spill] sm:$0xff] %v5952_v40  ;;  %v5959_v49 = vrot.slane %v2178_v30, %v5198_v41  ;;  %v5965_v62 = vrot.slane %v2194_v47, %v5198_v41  ;;  %v7775_v30 = vcombine.high %v5827_v61, %v5850_v52 }
 0x130   : > { %v3233_v54 = vcombine.low %v1634_v29, %v1638_v14  ;;  %v3234_v3 = vcombine.high %v1634_v29, %v1638_v14  ;;  %v2146_v39 = vcombine.high %v1633_v37, %v1637_v4  ;;  %807 = vbcast.lane.b32.xlu0 %v805_v1, 256  ;;  %v5941_v1 = vrot.slane %v1075_v50, %v5111_v45 }
 0x131   : > { %v504_v26 = vpop.permute.xlu1 %503  ;;  %v500_v0 = vpop.permute.xlu0 %499  ;;  %v2145_v51 = vcombine.low %v1633_v37, %v1637_v4  ;;  %7772 = vst [vmem:[#allocation49_spill] sm:$0xff] %v5965_v62  ;;  %v7773_v4 = vcombine.low %v5827_v61, %v5850_v52  ;;  %v5977_v37 = vrot.slane %v7775_v30, %v5198_v41  ;;  %v7777_v61 = vcombine.low %v5830_v56, %v5853_v20 }
 0x132   : > { %v1640_v17 = vmul.f32 %v1384_v5, %v504_v26  ;;  %v1639_v53 = vmul.f32 %v1384_v5, %v500_v0  ;;  %v3241_v14 = vrot.slane %v3233_v54, %v5137_v33  ;;  %v5956_v50 = vrot.slane %v3234_v3, %v5137_v33 }
 0x133   : > { %822 = vbcast.lane.b32.xlu1 %v816_v46, 264  ;;  %v5962_v26 = vrot.slane %v2193_v16, %v5198_v41  ;;  %7776 = vst [vmem:[#allocation51_spill] sm:$0xff] %v5977_v37  ;;  %v2153_v3 = vrot.slane %v2145_v51, %v5137_v33  ;;  %v2160_v0 = vrot.slane %v2146_v39, %v5137_v33 }
 0x134   : > { %818 = vbcast.lane.b32.xlu0 %v816_v46, 256  ;;  %v3249_v29 = vcombine.low %v1636_v11, %v1640_v17  ;;  %v3250_v57 = vcombine.high %v1636_v11, %v1640_v17  ;;  %v2161_v7 = vcombine.low %v1635_v42, %v1639_v53  ;;  %v2162_v38 = vcombine.high %v1635_v42, %v1639_v53 }
 0x135   : > { %v515_v63 = vpop.permute.xlu1 %514  ;;  %v511_v5 = vpop.permute.xlu0 %510  ;;  %v5971_v46 = vrot.slane %v7773_v4, %v5198_v41  ;;  %v5989_v52 = vrot.slane %v7777_v61, %v5198_v41 }
 0x136   : > { %v3257_v11 = vrot.slane %v3249_v29, %v5137_v33  ;;  %v3264_v16 = vrot.slane %v3250_v57, %v5137_v33  ;;  %v2169_v54 = vrot.slane %v2161_v7, %v5137_v33  ;;  %v2176_v47 = vrot.slane %v2162_v38, %v5137_v33 }
 0x137   : > { %7774 = vst [vmem:[#allocation50_spill] sm:$0xff] %v5971_v46  ;;  %833 = vbcast.lane.b32.xlu1 %v827_v25, 264  ;;  %7778 = vst [vmem:[#allocation52_spill] sm:$0xff] %v5989_v52  ;;  %v7779_v57 = vcombine.high %v5830_v56, %v5853_v20  ;;  %v1642_v61 = vmul.f32 %v5906_v55, %v515_v63  ;;  %v1641_v10 = vmul.f32 %v5906_v55, %v511_v5 }
 0x138   : > { %829 = vbcast.lane.b32.xlu0 %v827_v25, 256  ;;  %v3297_v7 = vcombine.low %v3241_v14, %v3257_v11  ;;  %v3298_v42 = vcombine.high %v3241_v14, %v3257_v11  ;;  %v3313_v17 = vcombine.low %v5956_v50, %v3264_v16  ;;  %v3314_v51 = vcombine.high %v5956_v50, %v3264_v16 }
 0x139   : > { %v5995_v29 = vrot.slane %v7779_v57, %v5198_v41  ;;  %v526_v39 = vpop.permute.xlu1 %525  ;;  %v2209_v25 = vcombine.low %v2153_v3, %v2169_v54  ;;  %v2210_v53 = vcombine.high %v2153_v3, %v2169_v54  ;;  %v2225_v38 = vcombine.low %v2160_v0, %v2176_v47  ;;  %v522_v30 = vpop.permute.xlu0 %521 }
 0x13a   : > { %v2226_v4 = vcombine.high %v2160_v0, %v2176_v47  ;;  %v6002_v56 = vrot.slane %v3297_v7, %v5198_v41  ;;  %v6005_v20 = vrot.slane %v3298_v42, %v5198_v41  ;;  %v6026_v54 = vrot.slane %v3313_v17, %v5198_v41 }
 0x13b   : > { %7780 = vst [vmem:[#allocation53_spill] sm:$0xff] %v5995_v29  ;;  %844 = vbcast.lane.b32.xlu1 %v838_v9, 264  ;;  %v6008_v14 = vrot.slane %v2209_v25, %v5198_v41  ;;  %v6011_v50 = vrot.slane %v2210_v53, %v5198_v41  ;;  %v6014_v11 = vrot.slane %v2225_v38, %v5198_v41 }
 0x13c   : > { %7781 = vst [vmem:[#allocation54_spill] sm:$0xff] %v6002_v56  ;;  %7782 = vst [vmem:[#allocation55_spill] sm:$0xff] %v6005_v20  ;;  %840 = vbcast.lane.b32.xlu0 %v838_v9, 256  ;;  %v6017_v63 = vrot.slane %v2226_v4, %v5198_v41  ;;  %v1644_v47 = vmul.f32 %v5921_v32, %v526_v39  ;;  %v1970_v57 = vcombine.high %v5497_v21, %v5535_v35 }
 0x13d   : > { %7783 = vst [vmem:[#allocation56_spill] sm:$0xff] %v6008_v14  ;;  %v537_v55 = vpop.permute.xlu1 %536  ;;  %7785 = vst [vmem:[#allocation58_spill] sm:$0xff] %v6026_v54  ;;  %v533_v0 = vpop.permute.xlu0 %532  ;;  %v6056_v4 = vrot.slane %v3314_v51, %v5198_v41  ;;  %v7787_v51 = vcombine.high %v5265_v28, %v5280_v43 }
 0x13e   : > { %7784 = vst [vmem:[#allocation57_spill] sm:$0xff] %v6017_v63  ;;  %v1646_v3 = vmul.f32 %v5929_v58, %v537_v55  ;;  %v1645_v42 = vmul.f32 %v5929_v58, %v533_v0 }
 0x13f   : > { %855 = vbcast.lane.b32.xlu1 %v5933_v13, 264  ;;  %7786 = vst [vmem:[#allocation59_spill] sm:$0xff] %v6056_v4 }
 0x140   : > { %v3337_v53 = vcombine.low %v1642_v61, %v1646_v3  ;;  %v3338_v38 = vcombine.high %v1642_v61, %v1646_v3  ;;  %851 = vbcast.lane.b32.xlu0 %v5933_v13, 256  ;;  %v2250_v55 = vcombine.high %v1641_v10, %v1645_v42  ;;  %v1643_v61 = vmul.f32 %v5921_v32, %v522_v30 }
 0x141   : > { %v548_v0 = vpop.permute.xlu1 %547  ;;  %v2249_v13 = vcombine.low %v1641_v10, %v1645_v42  ;;  %v544_v5 = vpop.permute.xlu0 %543  ;;  %v2106_v10 = vcombine.high %v5738_v34, %v5776_v44 }
 0x142   : > { %v1648_v3 = vmul.f32 %v5936_v19, %v548_v0  ;;  %v6059_v58 = vrot.slane %v3337_v53, %v5137_v33  ;;  %v6062_v39 = vrot.slane %v3338_v38, %v5137_v33  ;;  %v1647_v9 = vmul.f32 %v5936_v19, %v544_v5 }
 0x143   : > { %3891 = vrot.lane.b32.xlu1 %v1970_v57, %s4880_s17  ;;  %v2242_v57 = vcombine.high %v5952_v40, %v6008_v14  ;;  %v1125_v53 = vcombine.high %v5948_v31, %v5948_v31 }
 0x144   : > { %v3353_v32 = vcombine.low %v1644_v47, %v1648_v3  ;;  %v3354_v30 = vcombine.high %v1644_v47, %v1648_v3  ;;  %3889 = vrot.lane.b32.xlu0 %v7787_v51, %s4880_s17  ;;  %v2265_v19 = vcombine.low %v1643_v61, %v1647_v9  ;;  %v2266_v5 = vcombine.high %v1643_v61, %v1647_v9 }
 0x145   : > { %v559_v38 = vpop.permute.xlu1 %558  ;;  %v1107_v47 = vcombine.high %v5941_v1, %v5941_v1  ;;  %v555_v51 = vpop.permute.xlu0 %554  ;;  %v2257_v9 = vrot.slane %v2249_v13, %v5137_v33  ;;  %v2264_v61 = vrot.slane %v2250_v55, %v5137_v33 }
 0x146   : > { %v3361_v0 = vrot.slane %v3353_v32, %v5137_v33  ;;  %v6082_v3 = vrot.slane %v3354_v30, %v5137_v33  ;;  %v2273_v42 = vrot.slane %v2265_v19, %v5137_v33  ;;  %v2280_v16 = vrot.slane %v2266_v5, %v5137_v33 }
 0x147   : > { %3895 = vrot.lane.b32.xlu1 %v2242_v57, %s4880_s17  ;;  %v1133_v5 = vrot.slane %v5948_v31, %v5111_v45  ;;  %v1404_v57 = vrot.slane %v5941_v1, %v5019_v2  ;;  %v1110_v31 = vcombine.high %v5910_v18, %v5910_v18 }
 0x148   : > { %v3401_v32 = vcombine.low %v6059_v58, %v3361_v0  ;;  %v3402_v30 = vcombine.high %v6059_v58, %v3361_v0  ;;  %v3417_v17 = vcombine.low %v6062_v39, %v6082_v3  ;;  %v3418_v25 = vcombine.high %v6062_v39, %v6082_v3  ;;  %3893 = vrot.lane.b32.xlu0 %v2106_v10, %s4880_s17 }
 0x149   : > { %v2314_v13 = vcombine.high %v2257_v9, %v2273_v42  ;;  %v2329_v55 = vcombine.low %v2264_v61, %v2280_v16  ;;  %v2330_v7 = vcombine.high %v2264_v61, %v2280_v16  ;;  %v570_v19 = vpop.permute.xlu1 %569  ;;  %v566_v14 = vpop.permute.xlu0 %565  ;;  %v1109_v58 = vcombine.high %v5944_v15, %v5944_v15 }
 0x14a   : > { %v1147_v0 = vrot.slane %v1125_v53, %v5111_v45  ;;  %v1412_v39 = vrot.slane %v1107_v47, %v5019_v2  ;;  %v1155_v3 = vcombine.high %v1133_v5, %v1133_v5  ;;  %v1650_v10 = vmul.f32 %v1404_v57, %v559_v38 }
 0x14b   : > { %v1408_v16 = vrot.slane %v5944_v15, %v5019_v2  ;;  %v1416_v34 = vrot.slane %v1109_v58, %v5019_v2  ;;  %v1420_v35 = vrot.slane %v1133_v5, %v5019_v2  ;;  %v2313_v47 = vcombine.low %v2257_v9, %v2273_v42 }
 0x14c   : > { %v1157_v40 = vcombine.high %v1147_v0, %v1147_v0  ;;  %v6115_v53 = vrot.slane %v1147_v0, %v5019_v2  ;;  %v1649_v21 = vmul.f32 %v1404_v57, %v555_v51  ;;  %v6118_v43 = vrot.slane %v1155_v3, %v5019_v2 }
 0x14d   : > { %v581_v61 = vpop.permute.xlu1 %580  ;;  %v577_v1 = vpop.permute.xlu0 %576  ;;  %v1652_v15 = vmul.f32 %v1408_v16, %v570_v19  ;;  %v6124_v58 = vrot.slane %v1110_v31, %v5111_v45  ;;  %v6127_v5 = vmul.f32 0.5, %v5446_v23  ;;  %v6130_v42 = vrot.slane %v3401_v32, %v5198_v41 }
 0x14e   : > { %v1654_v44 = vmul.f32 %v1412_v39, %v581_v61  ;;  %v1653_v38 = vmul.f32 %v1412_v39, %v577_v1  ;;  %v6121_v18 = vrot.slane %v1157_v40, %v5019_v2  ;;  %v6133_v19 = vrot.slane %v3402_v30, %v5198_v41 }
 0x14f   : > { %7788 = vst [vmem:[#allocation60_spill] sm:$0xff] %v6130_v42  ;;  %v1651_v40 = vmul.f32 %v1408_v16, %v566_v14  ;;  %v6139_v39 = vrot.slane %v2313_v47, %v5198_v41  ;;  %v6142_v23 = vrot.slane %v2314_v13, %v5198_v41 }
 0x150   : > { %v3369_v28 = vcombine.low %v1650_v10, %v1654_v44  ;;  %v3370_v4 = vcombine.high %v1650_v10, %v1654_v44  ;;  %v2282_v61 = vcombine.high %v1649_v21, %v1653_v38  ;;  %v2281_v51 = vcombine.low %v1649_v21, %v1653_v38  ;;  %7789 = vst [vmem:[#allocation61_spill] sm:$0xff] %v6133_v19 }
 0x151   : > { %v592_v29 = vpop.permute.xlu1 %591  ;;  %v588_v57 = vpop.permute.xlu0 %587  ;;  %v6136_v44 = vrot.slane %v3417_v17, %v5198_v41  ;;  %7791 = vst [vmem:[#allocation63_spill] sm:$0xff] %v6139_v39  ;;  %v6147_v17 = vrot.slane %v2329_v55, %v5198_v41 }
 0x152   : > { %v1656_v9 = vmul.f32 %v1416_v34, %v592_v29  ;;  %v1655_v0 = vmul.f32 %v1416_v34, %v588_v57  ;;  %v3377_v32 = vrot.slane %v3369_v28, %v5137_v33  ;;  %v3384_v21 = vrot.slane %v3370_v4, %v5137_v33 }
 0x153   : > { %7790 = vst [vmem:[#allocation62_spill] sm:$0xff] %v6136_v44  ;;  %v6150_v34 = vrot.slane %v2330_v7, %v5198_v41  ;;  %v2289_v14 = vrot.slane %v2281_v51, %v5137_v33  ;;  %v6156_v4 = vrot.slane %v3418_v25, %v5198_v41  ;;  %v2296_v1 = vrot.slane %v2282_v61, %v5137_v33 }
 0x154   : > { %v3385_v29 = vcombine.low %v1652_v15, %v1656_v9  ;;  %v3386_v3 = vcombine.high %v1652_v15, %v1656_v9  ;;  %v2297_v10 = vcombine.low %v1651_v40, %v1655_v0  ;;  %v2298_v30 = vcombine.high %v1651_v40, %v1655_v0 }
 0x155   : > { %v603_v31 = vpop.permute.xlu1 %602  ;;  %7792 = vst [vmem:[#allocation64_spill] sm:$0xff] %v6150_v34  ;;  %v599_v28 = vpop.permute.xlu0 %598  ;;  %7793 = vst [vmem:[#allocation65_spill] sm:$0xff] %v6156_v4 }
 0x156   : > { %v3393_v13 = vrot.slane %v3385_v29, %v5137_v33  ;;  %v3400_v16 = vrot.slane %v3386_v3, %v5137_v33  ;;  %v2305_v47 = vrot.slane %v2297_v10, %v5137_v33  ;;  %v2312_v55 = vrot.slane %v2298_v30, %v5137_v33 }
 0x157   : > { %v1658_v38 = vmul.f32 %v1420_v35, %v603_v31  ;;  %v1657_v54 = vmul.f32 %v1420_v35, %v599_v28 }
 0x158   : > { %v3433_v15 = vcombine.low %v3377_v32, %v3393_v13  ;;  %v3434_v7 = vcombine.high %v3377_v32, %v3393_v13  ;;  %v3449_v9 = vcombine.low %v3384_v21, %v3400_v16  ;;  %v3450_v57 = vcombine.high %v3384_v21, %v3400_v16 }
 0x159   : > { %v2345_v51 = vcombine.low %v2289_v14, %v2305_v47  ;;  %v2346_v40 = vcombine.high %v2289_v14, %v2305_v47  ;;  %v2361_v0 = vcombine.low %v2296_v1, %v2312_v55  ;;  %v2362_v29 = vcombine.high %v2296_v1, %v2312_v55  ;;  %v614_v3 = vpop.permute.xlu1 %613  ;;  %v610_v52 = vpop.permute.xlu0 %609 }
 0x15a   : > { %v1660_v25 = vmul.f32 %v6115_v53, %v614_v3  ;;  %v6163_v61 = vrot.slane %v3433_v15, %v5198_v41  ;;  %v6166_v10 = vrot.slane %v3434_v7, %v5198_v41  ;;  %v6178_v35 = vrot.slane %v3449_v9, %v5198_v41 }
 0x15b   : > { %v6169_v30 = vrot.slane %v2345_v51, %v5198_v41  ;;  %v6172_v32 = vrot.slane %v2346_v40, %v5198_v41  ;;  %v6175_v21 = vrot.slane %v2361_v0, %v5198_v41  ;;  %v6181_v31 = vrot.slane %v2362_v29, %v5198_v41 }
 0x15c   : > { %7794 = vst [vmem:[#allocation66_spill] sm:$0xff] %v6163_v61  ;;  %7795 = vst [vmem:[#allocation67_spill] sm:$0xff] %v6166_v10  ;;  %v6213_v14 = vrot.slane %v3450_v57, %v5198_v41  ;;  %v1140_v3 = vrot.slane %v6124_v58, %v5111_v45  ;;  %v1659_v57 = vmul.f32 %v6115_v53, %v610_v52 }
 0x15d   : > { %7796 = vst [vmem:[#allocation68_spill] sm:$0xff] %v6169_v30  ;;  %7797 = vst [vmem:[#allocation69_spill] sm:$0xff] %v6178_v35  ;;  %v625_v28 = vpop.permute.xlu1 %624  ;;  %v2378_v1 = vcombine.high %v6139_v39, %v6169_v30  ;;  %v621_v9 = vpop.permute.xlu0 %620 }
 0x15e   : > { %7798 = vst [vmem:[#allocation70_spill] sm:$0xff] %v6181_v31  ;;  %v1662_v7 = vmul.f32 %v6118_v43, %v625_v28  ;;  %v1661_v29 = vmul.f32 %v6118_v43, %v621_v9  ;;  %7799 = vst [vmem:[#allocation71_spill] sm:$0xff] %v6213_v14  ;;  %v1166_v28 = vrot.slane %v6127_v5, %v5111_v45 }
 0x15f   : > { %3897 = vrot.lane.b32.xlu0 %v2378_v1, %s4880_s17 }
 0x160   : > { %v3473_v51 = vcombine.low %v1658_v38, %v1662_v7  ;;  %v3474_v13 = vcombine.high %v1658_v38, %v1662_v7  ;;  %v2386_v43 = vcombine.high %v1657_v54, %v1661_v29  ;;  %v2385_v7 = vcombine.low %v1657_v54, %v1661_v29 }
 0x161   : > { %v636_v9 = vpop.permute.xlu1 %635  ;;  %v632_v40 = vpop.permute.xlu0 %631  ;;  %v1126_v38 = vcombine.high %v6124_v58, %v6124_v58 }
 0x162   : > { %v1664_v1 = vmul.f32 %v6121_v18, %v636_v9  ;;  %v1663_v16 = vmul.f32 %v6121_v18, %v632_v40  ;;  %v3481_v9 = vrot.slane %v3473_v51, %v5137_v33  ;;  %v6230_v15 = vrot.slane %v3474_v13, %v5137_v33 }
 0x163   : > { %v1156_v18 = vcombine.high %v1140_v3, %v1140_v3  ;;  %v1174_v40 = vcombine.high %v1166_v28, %v1166_v28  ;;  %v2393_v51 = vrot.slane %v2385_v7, %v5137_v33  ;;  %v2400_v13 = vrot.slane %v2386_v43, %v5137_v33 }
 0x164   : > { %v3489_v55 = vcombine.low %v1660_v25, %v1664_v1  ;;  %v3490_v47 = vcombine.high %v1660_v25, %v1664_v1  ;;  %v2401_v30 = vcombine.low %v1659_v57, %v1663_v16  ;;  %v2402_v39 = vcombine.high %v1659_v57, %v1663_v16 }
 0x165   : > { %v647_v35 = vpop.permute.xlu1 %646  ;;  %v643_v53 = vpop.permute.xlu0 %642  ;;  %v1154_v14 = vrot.slane %v1126_v38, %v5111_v45  ;;  %v1436_v43 = vrot.slane %v1140_v3, %v5019_v2  ;;  %v1196_v44 = vrot.slane %v1174_v40, %v5111_v45 }
 0x166   : > { %v3497_v52 = vrot.slane %v3489_v55, %v5137_v33  ;;  %v6236_v54 = vrot.slane %v3490_v47, %v5137_v33  ;;  %v2409_v25 = vrot.slane %v2401_v30, %v5137_v33  ;;  %v2416_v16 = vrot.slane %v2402_v39, %v5137_v33 }
 0x167   : > { %v1444_v30 = vrot.slane %v1156_v18, %v5019_v2  ;;  %v1158_v39 = vcombine.high %v1154_v14, %v1154_v14  ;;  %v1440_v47 = vrot.slane %v1154_v14, %v5019_v2  ;;  %v1665_v38 = vmul.f32 %v1436_v43, %v643_v53 }
 0x168   : > { %v3537_v29 = vcombine.low %v3481_v9, %v3497_v52  ;;  %v3538_v1 = vcombine.high %v3481_v9, %v3497_v52  ;;  %v3553_v58 = vcombine.low %v6230_v15, %v6236_v54  ;;  %v2450_v55 = vcombine.high %v2393_v51, %v2409_v25 }
 0x169   : > { %v2465_v57 = vcombine.low %v2400_v13, %v2416_v16  ;;  %v2466_v0 = vcombine.high %v2400_v13, %v2416_v16  ;;  %v658_v7 = vpop.permute.xlu1 %657  ;;  %v654_v4 = vpop.permute.xlu0 %653  ;;  %v1182_v9 = vrot.slane %v1166_v28, %v5111_v45  ;;  %v1666_v52 = vmul.f32 %v1436_v43, %v647_v35 }
 0x16a   : > { %v1206_v16 = vcombine.high %v1196_v44, %v1196_v44  ;;  %v1448_v3 = vrot.slane %v1158_v39, %v5019_v2  ;;  %v1668_v18 = vmul.f32 %v1440_v47, %v658_v7  ;;  %v6257_v35 = vrot.slane %v1196_v44, %v5019_v2 }
 0x16b   : > { %v1204_v37 = vcombine.high %v1182_v9, %v1182_v9  ;;  %v6254_v10 = vrot.slane %v1182_v9, %v5019_v2  ;;  %v2449_v40 = vcombine.low %v2393_v51, %v2409_v25  ;;  %v6268_v7 = vrot.slane %v3537_v29, %v5198_v41 }
 0x16c   : > { %v1667_v44 = vmul.f32 %v1440_v47, %v654_v4  ;;  %v6292_v47 = vrot.slane %v2466_v0, %v5198_v41 }
 0x16d   : > { %v669_v20 = vpop.permute.xlu1 %668  ;;  %v665_v13 = vpop.permute.xlu0 %664  ;;  %7800 = vst [vmem:[#allocation72_spill] sm:$0xff] %v6268_v7  ;;  %v6279_v29 = vrot.slane %v2449_v40, %v5198_v41 }
 0x16e   : > { %v1670_v56 = vmul.f32 %v1444_v30, %v669_v20  ;;  %v1669_v46 = vmul.f32 %v1444_v30, %v665_v13  ;;  %v6260_v20 = vrot.slane %v1204_v37, %v5019_v2  ;;  %v6265_v30 = vrot.slane %v1206_v16, %v5019_v2  ;;  %7805 = vst [vmem:[#allocation77_spill] sm:$0xff] %v6292_v47 }
 0x16f   : > { %v6274_v37 = vrot.slane %v3553_v58, %v5198_v41  ;;  %7803 = vst [vmem:[#allocation75_spill] sm:$0xff] %v6279_v29 }
 0x170   : > { %v3505_v19 = vcombine.low %v1666_v52, %v1670_v56  ;;  %v3506_v28 = vcombine.high %v1666_v52, %v1670_v56  ;;  %v2418_v61 = vcombine.high %v1665_v38, %v1669_v46  ;;  %v6271_v56 = vrot.slane %v3538_v1, %v5198_v41 }
 0x171   : > { %v680_v42 = vpop.permute.xlu1 %679  ;;  %v676_v43 = vpop.permute.xlu0 %675  ;;  %v2417_v51 = vcombine.low %v1665_v38, %v1669_v46  ;;  %7802 = vst [vmem:[#allocation74_spill] sm:$0xff] %v6274_v37  ;;  %v6282_v1 = vrot.slane %v2450_v55, %v5198_v41 }
 0x172   : > { %v1672_v53 = vmul.f32 %v1448_v3, %v680_v42  ;;  %7801 = vst [vmem:[#allocation73_spill] sm:$0xff] %v6271_v56  ;;  %v1671_v25 = vmul.f32 %v1448_v3, %v676_v43  ;;  %v3513_v39 = vrot.slane %v3505_v19, %v5137_v33  ;;  %v3520_v42 = vrot.slane %v3506_v28, %v5137_v33 }
 0x173   : > { %v6289_v19 = vrot.slane %v2465_v57, %v5198_v41  ;;  %v2425_v38 = vrot.slane %v2417_v51, %v5137_v33  ;;  %v2432_v3 = vrot.slane %v2418_v61, %v5137_v33 }
 0x174   : > { %v3521_v9 = vcombine.low %v1668_v18, %v1672_v53  ;;  %v3522_v52 = vcombine.high %v1668_v18, %v1672_v53  ;;  %v2433_v13 = vcombine.low %v1667_v44, %v1671_v25  ;;  %v2434_v16 = vcombine.high %v1667_v44, %v1671_v25 }
 0x175   : > { %v691_v14 = vpop.permute.xlu1 %690  ;;  %v6286_v58 = vpop.permute.xlu0 %686  ;;  %7804 = vst [vmem:[#allocation76_spill] sm:$0xff] %v6289_v19 }
 0x176   : > { %v3529_v46 = vrot.slane %v3521_v9, %v5137_v33  ;;  %v3536_v4 = vrot.slane %v3522_v52, %v5137_v33  ;;  %v2441_v18 = vrot.slane %v2433_v13, %v5137_v33  ;;  %v2448_v55 = vrot.slane %v2434_v16, %v5137_v33 }
 0x177   : > { %v1674_v0 = vmul.f32 %v6254_v10, %v691_v14 }
 0x178   : > { %v3569_v28 = vcombine.low %v3513_v39, %v3529_v46  ;;  %v3570_v40 = vcombine.high %v3513_v39, %v3529_v46  ;;  %v3585_v53 = vcombine.low %v3520_v42, %v3536_v4  ;;  %v3586_v43 = vcombine.high %v3520_v42, %v3536_v4 }
 0x179   : > { %v2481_v44 = vcombine.low %v2425_v38, %v2441_v18  ;;  %v2482_v25 = vcombine.high %v2425_v38, %v2441_v18  ;;  %v2497_v9 = vcombine.low %v2432_v3, %v2448_v55  ;;  %v2498_v57 = vcombine.high %v2432_v3, %v2448_v55  ;;  %v702_v52 = vpop.permute.xlu1 %701 }
 0x17a   : > { %v698_v12 = vpop.permute.xlu0 %697  ;;  %v6300_v51 = vrot.slane %v3569_v28, %v5198_v41  ;;  %v6303_v61 = vrot.slane %v3570_v40, %v5198_v41  ;;  %v7808_v39 = vcombine.high %v6230_v15, %v6236_v54  ;;  %v6321_v46 = vrot.slane %v3585_v53, %v5198_v41 }
 0x17b   : > { %v6312_v42 = vrot.slane %v2481_v44, %v5198_v41  ;;  %v6315_v16 = vrot.slane %v2482_v25, %v5198_v41  ;;  %v6318_v14 = vrot.slane %v2497_v9, %v5198_v41  ;;  %v6324_v4 = vrot.slane %v2498_v57, %v5198_v41 }
 0x17c   : > { %7806 = vst [vmem:[#allocation78_spill] sm:$0xff] %v6300_v51  ;;  %7807 = vst [vmem:[#allocation79_spill] sm:$0xff] %v6303_v61  ;;  %v6309_v13 = vrot.slane %v7808_v39, %v5198_v41  ;;  %v1676_v39 = vmul.f32 %v6257_v35, %v702_v52  ;;  %v6356_v9 = vrot.slane %v3586_v43, %v5198_v41 }
 0x17d   : > { %7810 = vst [vmem:[#allocation81_spill] sm:$0xff] %v6312_v42  ;;  %7811 = vst [vmem:[#allocation82_spill] sm:$0xff] %v6318_v14  ;;  %v713_v3 = vpop.permute.xlu1 %712  ;;  %v2514_v18 = vcombine.high %v6279_v29, %v6312_v42 }
 0x17e   : > { %7809 = vst [vmem:[#allocation80_spill] sm:$0xff] %v6309_v13  ;;  %7812 = vst [vmem:[#allocation83_spill] sm:$0xff] %v6321_v46  ;;  %v1678_v53 = vmul.f32 %v6260_v20, %v713_v3  ;;  %v709_v44 = vpop.permute.xlu0 %708  ;;  %v6392_v13 = vld [vmem:[%s5010_s30 + $0x38] sm:$0xff] }
 0x17f   : > { %7813 = vst [vmem:[#allocation84_spill] sm:$0xff] %v6324_v4  ;;  %3899 = vrot.lane.b32.xlu1 %v2514_v18, %s4880_s17  ;;  %7814 = vst [vmem:[#allocation85_spill] sm:$0xff] %v6356_v9  ;;  %v7815_v18 = vcombine.high %v6127_v5, %v6127_v5  ;;  %v6395_v46 = vmul.f32 0.5, %v6392_v13 }
 0x180   : > { %v3609_v25 = vcombine.low %v1674_v0, %v1678_v53  ;;  %v3610_v15 = vcombine.high %v1674_v0, %v1678_v53  ;;  %7816 = vst [vmem:[#allocation86_spill] sm:$0xff] %v6392_v13 }
 0x181   : > { %v724_v52 = vpop.permute.xlu1 %723  ;;  %v1173_v38 = vrot.slane %v7815_v18, %v5111_v45 }
 0x182   : > { %v1680_v40 = vmul.f32 %v6265_v30, %v724_v52  ;;  %v720_v3 = vpop.permute.xlu0 %719  ;;  %v6370_v43 = vrot.slane %v3609_v25, %v5137_v33  ;;  %v6373_v53 = vrot.slane %v3610_v15, %v5137_v33 }
 0x183   : > { %v1189_v5 = vrot.slane %v1173_v38, %v5111_v45  ;;  %v1175_v52 = vcombine.high %v1173_v38, %v1173_v38 }
 0x184   : > { %v3625_v57 = vcombine.low %v1676_v39, %v1680_v40  ;;  %v3626_v28 = vcombine.high %v1676_v39, %v1680_v40 }
 0x185   : > { %v735_v18 = vpop.permute.xlu1 %734  ;;  %v1205_v0 = vcombine.high %v1189_v5, %v1189_v5  ;;  %v1203_v39 = vrot.slane %v1175_v52, %v5111_v45  ;;  %v6402_v52 = vmul.f32 %v6257_v35, %v698_v12 }
 0x186   : > { %v3633_v55 = vrot.slane %v3625_v57, %v5137_v33  ;;  %v6378_v54 = vrot.slane %v3626_v28, %v5137_v33  ;;  %v731_v42 = vpop.permute.xlu0 %730  ;;  %v6388_v57 = vmul.f32 %v6265_v30, %v720_v3  ;;  %v1468_v28 = vrot.slane %v1189_v5, %v5019_v2 }
 0x187   : > { %v1207_v40 = vcombine.high %v1203_v39, %v1203_v39  ;;  %v6406_v30 = vmul.f32 %v6254_v10, %v6286_v58  ;;  %v1472_v13 = vrot.slane %v1203_v39, %v5019_v2 }
 0x188   : > { %v3673_v25 = vcombine.low %v6370_v43, %v3633_v55  ;;  %v3674_v29 = vcombine.high %v6370_v43, %v3633_v55  ;;  %v6398_v55 = vmul.f32 %v6260_v20, %v709_v44  ;;  %v1476_v43 = vrot.slane %v1205_v0, %v5019_v2 }
 0x189   : > { %v746_v38 = vpop.permute.xlu1 %745  ;;  %v1682_v15 = vmul.f32 %v1468_v28, %v735_v18  ;;  %v2537_v5 = vcombine.low %v6402_v52, %v6388_v57  ;;  %v1215_v44 = vrot.slane %v6395_v46, %v5111_v45  ;;  %v1480_v0 = vrot.slane %v1207_v40, %v5019_v2 }
 0x18a   : > { %v742_v9 = vpop.permute.xlu0 %741  ;;  %v2521_v12 = vcombine.low %v6406_v30, %v6398_v55  ;;  %v1684_v10 = vmul.f32 %v1472_v13, %v746_v38  ;;  %v6418_v61 = vmul.f32 %v1468_v28, %v731_v42 }
 0x18b   : > { %v1223_v51 = vcombine.high %v1215_v44, %v1215_v44  ;;  %v6421_v39 = vrot.slane %v2537_v5, %v5137_v33  ;;  %v1231_v4 = vrot.slane %v1215_v44, %v5111_v45 }
 0x18c   : > { %v6425_v47 = vrot.slane %v2521_v12, %v5137_v33 }
 0x18d   : > { %v757_v3 = vpop.permute.xlu1 %756  ;;  %v1253_v12 = vcombine.high %v1231_v4, %v1231_v4  ;;  %v6459_v63 = vrot.slane %v1231_v4, %v5019_v2  ;;  %v7822_v4 = vcombine.low %v6373_v53, %v6378_v54 }
 0x18e   : > { %v1686_v37 = vmul.f32 %v1476_v43, %v757_v3  ;;  %v753_v20 = vpop.permute.xlu0 %752 }
 0x18f   : > { %v6415_v35 = vmul.f32 %v1476_v43, %v753_v20  ;;  %v6427_v43 = vmul.f32 %v1472_v13, %v742_v9  ;;  %v1245_v20 = vrot.slane %v1223_v51, %v5111_v45  ;;  %v2585_v13 = vcombine.low %v6425_v47, %v6421_v39 }
 0x190   : > { %v3641_v58 = vcombine.low %v1682_v15, %v1686_v37  ;;  %v3642_v18 = vcombine.high %v1682_v15, %v1686_v37  ;;  %v6454_v51 = vrot.slane %v3674_v29, %v5198_v41 }
 0x191   : > { %v768_v56 = vpop.permute.xlu1 %767  ;;  %v2553_v40 = vcombine.low %v6418_v61, %v6415_v35 }
 0x192   : > { %v1688_v3 = vmul.f32 %v1480_v0, %v768_v56  ;;  %v764_v7 = vpop.permute.xlu0 %763  ;;  %v3649_v42 = vrot.slane %v3641_v58, %v5137_v33  ;;  %v3656_v15 = vrot.slane %v3642_v18, %v5137_v33  ;;  %v6451_v58 = vrot.slane %v3673_v25, %v5198_v41  ;;  %7817 = vst [vmem:[#allocation87_spill] sm:$0xff] %v6454_v51 }
 0x193   : > { %v6431_v37 = vmul.f32 %v1480_v0, %v764_v7  ;;  %v6445_v0 = vrot.slane %v2553_v40, %v5137_v33  ;;  %v1255_v25 = vcombine.high %v1245_v20, %v1245_v20 }
 0x194   : > { %v3657_v38 = vcombine.low %v1684_v10, %v1688_v3  ;;  %v3658_v28 = vcombine.high %v1684_v10, %v1688_v3 }
 0x195   : > { %v2569_v56 = vcombine.low %v6427_v43, %v6431_v37  ;;  %v779_v5 = vpop.permute.xlu1 %778  ;;  %v1496_v19 = vrot.slane %v1255_v25, %v5019_v2 }
 0x196   : > { %v3665_v9 = vrot.slane %v3657_v38, %v5137_v33  ;;  %v3672_v7 = vrot.slane %v3658_v28, %v5137_v33  ;;  %v6442_v44 = vpop.permute.xlu0 %774 }
 0x197   : > { %v6448_v10 = vrot.slane %v2569_v56, %v5137_v33  ;;  %v1492_v56 = vrot.slane %v1253_v12, %v5019_v2  ;;  %v1690_v12 = vmul.f32 %v6459_v63, %v779_v5 }
 0x198   : > { %v3705_v18 = vcombine.low %v3649_v42, %v3665_v9  ;;  %v3706_v3 = vcombine.high %v3649_v42, %v3665_v9  ;;  %v3721_v38 = vcombine.low %v3656_v15, %v3672_v7  ;;  %v3722_v60 = vcombine.high %v3656_v15, %v3672_v7 }
 0x199   : > { %v2617_v28 = vcombine.low %v6445_v0, %v6448_v10  ;;  %v790_v40 = vpop.permute.xlu1 %789  ;;  %v6471_v42 = vrot.slane %v2585_v13, %v5198_v41  ;;  %v6480_v9 = vrot.slane %v7822_v4, %v5198_v41  ;;  %v7825_v13 = vcombine.high %v6373_v53, %v6378_v54 }
 0x19a   : > { %v6461_v62 = vpop.permute.xlu0 %785  ;;  %v6465_v31 = vrot.slane %v3705_v18, %v5198_v41  ;;  %v6468_v29 = vrot.slane %v3706_v3, %v5198_v41  ;;  %v6483_v7 = vrot.slane %v3721_v38, %v5198_v41  ;;  %v1208_v38 = vcombine.high %v6395_v46, %v6395_v46 }
 0x19b   : > { %7820 = vst [vmem:[#allocation90_spill] sm:$0xff] %v6471_v42  ;;  %v6474_v15 = vrot.slane %v2617_v28, %v5198_v41  ;;  %7823 = vst [vmem:[#allocation92_spill] sm:$0xff] %v6480_v9  ;;  %v1488_v28 = vrot.slane %v1245_v20, %v5019_v2  ;;  %v6502_v18 = vrot.slane %v7825_v13, %v5198_v41 }
 0x19c   : > { %7818 = vst [vmem:[#allocation88_spill] sm:$0xff] %v6465_v31  ;;  %7819 = vst [vmem:[#allocation89_spill] sm:$0xff] %v6468_v29  ;;  %v6512_v51 = vrot.slane %v3722_v60, %v5198_v41  ;;  %v7828_v60 = vcombine.low %v5271_v22, %v5283_v36 }
 0x19d   : > { %7821 = vst [vmem:[#allocation91_spill] sm:$0xff] %v6474_v15  ;;  %7824 = vst [vmem:[#allocation93_spill] sm:$0xff] %v6483_v7  ;;  %v801_v34 = vpop.permute.xlu1 %800  ;;  %v2650_v4 = vcombine.high %v6471_v42, %v6474_v15  ;;  %v1692_v3 = vmul.f32 %v1488_v28, %v790_v40  ;;  %v1222_v40 = vrot.slane %v1208_v38, %v5111_v45 }
 0x19e   : > { %v1694_v14 = vmul.f32 %v1492_v56, %v801_v34  ;;  %v797_v5 = vpop.permute.xlu0 %796  ;;  %7826 = vst [vmem:[#allocation94_spill] sm:$0xff] %v6502_v18  ;;  %7827 = vst [vmem:[#allocation95_spill] sm:$0xff] %v6512_v51 }
 0x19f   : > { %3901 = vrot.lane.b32.xlu0 %v2650_v4, %s4880_s17  ;;  %v1224_v34 = vcombine.high %v1222_v40, %v1222_v40  ;;  %v6557_v18 = vmul.f32 %v1492_v56, %v797_v5 }
 0x1a0   : > { %v3745_v46 = vcombine.low %v1690_v12, %v1694_v14  ;;  %v3746_v25 = vcombine.high %v1690_v12, %v1694_v14 }
 0x1a1   : > { %v812_v53 = vpop.permute.xlu1 %811 }
 0x1a2   : > { %v1696_v13 = vmul.f32 %v1496_v19, %v812_v53  ;;  %v808_v4 = vpop.permute.xlu0 %807  ;;  %v6520_v29 = vrot.slane %v3745_v46, %v5137_v33  ;;  %v6527_v14 = vrot.slane %v3746_v25, %v5137_v33  ;;  %v2618_v53 = vcombine.high %v6445_v0, %v6448_v10 }
 0x1a3   : > { %3921 = vrot.lane.b32.xlu0 %v7828_v60, %s4881_s25  ;;  %v1238_v46 = vrot.slane %v1222_v40, %v5111_v45  ;;  %v2586_v25 = vcombine.high %v6425_v47, %v6421_v39  ;;  %v6554_v39 = vmul.f32 %v1496_v19, %v808_v4  ;;  %v6572_v4 = vmul.f32 %v6459_v63, %v6442_v44 }
 0x1a4   : > { %v3761_v12 = vcombine.low %v1692_v3, %v1696_v13  ;;  %v3762_v54 = vcombine.high %v1692_v3, %v1696_v13  ;;  %v7829_v3 = vcombine.low %v5744_v6, %v5779_v24  ;;  %v6552_v47 = vrot.slane %v2618_v53, %v5198_v41 }
 0x1a5   : > { %v823_v20 = vpop.permute.xlu1 %822  ;;  %v1254_v13 = vcombine.high %v1238_v46, %v1238_v46  ;;  %v6568_v53 = vmul.f32 %v1488_v28, %v6461_v62  ;;  %v2657_v62 = vcombine.low %v6572_v4, %v6557_v18 }
 0x1a6   : > { %v3769_v15 = vrot.slane %v3761_v12, %v5137_v33  ;;  %v6536_v42 = vrot.slane %v3762_v54, %v5137_v33  ;;  %v819_v60 = vpop.permute.xlu0 %818  ;;  %v1252_v12 = vrot.slane %v1224_v34, %v5111_v45  ;;  %v6565_v45 = vrot.slane %v2586_v25, %v5198_v41 }
 0x1a7   : > { %3925 = vrot.lane.b32.xlu0 %v7829_v3, %s4881_s25  ;;  %v1500_v3 = vrot.slane %v1238_v46, %v5019_v2  ;;  %v2673_v46 = vcombine.low %v6568_v53, %v6554_v39  ;;  %v6591_v31 = vrot.slane %v2657_v62, %v5137_v33 }
 0x1a8   : > { %v3809_v0 = vcombine.low %v6520_v29, %v3769_v15  ;;  %v3810_v10 = vcombine.high %v6520_v29, %v3769_v15  ;;  %v7830_v29 = vcombine.low %v6142_v23, %v6172_v32  ;;  %v1508_v15 = vrot.slane %v1254_v13, %v5019_v2 }
 0x1a9   : > { %v834_v38 = vpop.permute.xlu1 %833  ;;  %v1256_v34 = vcombine.high %v1252_v12, %v1252_v12  ;;  %v1698_v19 = vmul.f32 %v1500_v3, %v823_v20  ;;  %v2651_v5 = vcombine.low %v6565_v45, %v6552_v47  ;;  %v1504_v13 = vrot.slane %v1252_v12, %v5019_v2 }
 0x1aa   : > { %v830_v51 = vpop.permute.xlu0 %829  ;;  %v6585_v40 = vmul.f32 %v1500_v3, %v819_v60  ;;  %v6588_v9 = vrot.slane %v2673_v46, %v5137_v33 }
 0x1ab   : > { %3929 = vrot.lane.b32.xlu0 %v7830_v29, %s4881_s25  ;;  %v1512_v63 = vrot.slane %v1256_v34, %v5019_v2  ;;  %v1700_v44 = vmul.f32 %v1504_v13, %v834_v38  ;;  %v7831_v38 = vcombine.high %v5271_v22, %v5283_v36  ;;  %v7832_v36 = vcombine.high %v5744_v6, %v5779_v24 }
 0x1ac   : > { %v7835_v6 = vcombine.high %v6142_v23, %v6172_v32 }
 0x1ad   : > { %v845_v56 = vpop.permute.xlu1 %844 }
 0x1ae   : > { %v1702_v25 = vmul.f32 %v1508_v15, %v845_v56  ;;  %v841_v29 = vpop.permute.xlu0 %840 }
 0x1af   : > { %v6581_v28 = vmul.f32 %v1508_v15, %v841_v29  ;;  %3933 = vrot.lane.b32.xlu0 %v2651_v5, %s4881_s25  ;;  %v6593_v15 = vmul.f32 %v1504_v13, %v830_v51  ;;  %v6621_v29 = vrot.slane %v3810_v10, %v5198_v41  ;;  %v7838_v10 = vcombine.low %v6527_v14, %v6536_v42 }
 0x1b0   : > { %v3777_v20 = vcombine.low %v1698_v19, %v1702_v25  ;;  %v3778_v54 = vcombine.high %v1698_v19, %v1702_v25  ;;  %v2721_v19 = vcombine.low %v6591_v31, %v6588_v9 }
 0x1b1   : > { %v856_v7 = vpop.permute.xlu1 %855  ;;  %v2689_v5 = vcombine.low %v6585_v40, %v6581_v28 }
 0x1b2   : > { %v1704_v12 = vmul.f32 %v1512_v63, %v856_v7  ;;  %v852_v56 = vpop.permute.xlu0 %851  ;;  %v3785_v60 = vrot.slane %v3777_v20, %v5137_v33  ;;  %v3792_v7 = vrot.slane %v3778_v54, %v5137_v33  ;;  %v6618_v54 = vrot.slane %v3809_v0, %v5198_v41 }
 0x1b3   : > { %v6597_v2 = vmul.f32 %v1512_v63, %v852_v56  ;;  %3953 = vrot.lane.b32.xlu0 %v7831_v38, %s4882_s27  ;;  %v2697_v25 = vrot.slane %v2689_v5, %v5137_v33  ;;  %v6634_v24 = vrot.slane %v2721_v19, %v5198_v41  ;;  %v6643_v38 = vrot.slane %v7838_v10, %v5198_v41 }
 0x1b4   : > { %v3793_v3 = vcombine.low %v1700_v44, %v1704_v12  ;;  %v3794_v34 = vcombine.high %v1700_v44, %v1704_v12  ;;  %7833 = vst [vmem:[#allocation96_spill] sm:$0xff] %v6618_v54  ;;  %v7839_v19 = vcombine.high %v6527_v14, %v6536_v42 }
 0x1b5   : > { %v2705_v51 = vcombine.low %v6593_v15, %v6597_v2  ;;  %7836 = vst [vmem:[#allocation98_spill] sm:$0xff] %v6634_v24 }
 0x1b6   : > { %v3801_v46 = vrot.slane %v3793_v3, %v5137_v33  ;;  %v3808_v13 = vrot.slane %v3794_v34, %v5137_v33  ;;  %v2570_v3 = vcombine.high %v6427_v43, %v6431_v37  ;;  %v7940_v43 = vld [vmem:[#allocation62_spill] sm:$0xff]  ;;  %v7944_v37 = vld [vmem:[#allocation93_spill] sm:$0xff] }
 0x1b7   : > { %v2713_v22 = vrot.slane %v2705_v51, %v5137_v33  ;;  %3957 = vrot.lane.b32.xlu0 %v7832_v36, %s4882_s27  ;;  %v2652_v51 = vcombine.high %v6565_v45, %v6552_v47  ;;  %v2554_v36 = vcombine.high %v6418_v61, %v6415_v35  ;;  %v2522_v61 = vcombine.high %v6406_v30, %v6398_v55  ;;  %v7842_v55 = vld [vmem:[#allocation9_spill] sm:$0xff]  ;;  %v7843_v30 = vld [vmem:[#allocation11_spill] sm:$0xff] }
 0x1b8   : > { %v3841_v62 = vcombine.low %v3785_v60, %v3801_v46  ;;  %v3842_v63 = vcombine.high %v3785_v60, %v3801_v46  ;;  %v3857_v44 = vcombine.low %v3792_v7, %v3808_v13  ;;  %v3858_v20 = vcombine.high %v3792_v7, %v3808_v13  ;;  %v7941_v47 = vld [vmem:[#allocation69_spill] sm:$0xff] }
 0x1b9   : > { %v2753_v12 = vcombine.low %v2697_v25, %v2713_v22  ;;  %v6664_v46 = vrot.slane %v7839_v19, %v5198_v41  ;;  %v2538_v13 = vcombine.high %v6402_v52, %v6388_v57  ;;  %v2584_v52 = vrot.slane %v2570_v3, %v5137_v33  ;;  %v7846_v19 = vld [vmem:[#allocation41_spill] sm:$0xff] }
 0x1ba   : > { %v6624_v56 = vrot.slane %v3841_v62, %v5198_v41  ;;  %v6627_v5 = vrot.slane %v3842_v63, %v5198_v41  ;;  %v6646_v60 = vrot.slane %v3857_v44, %v5198_v41  ;;  %v6679_v14 = vrot.slane %v3858_v20, %v5198_v41  ;;  %v7840_v63 = vld [vmem:[#allocation28_spill] sm:$0xff] }
 0x1bb   : > { %3961 = vrot.lane.b32.xlu0 %v7835_v6, %s4882_s27  ;;  %v6637_v0 = vrot.slane %v2753_v12, %v5198_v41  ;;  %v2552_v45 = vrot.slane %v2538_v13, %v5137_v33  ;;  %v2568_v62 = vrot.slane %v2554_v36, %v5137_v33  ;;  %v7841_v44 = vcombine.low %v5503_v27, %v7840_v63 }
 0x1bc   : > { %7834 = vst [vmem:[#allocation97_spill] sm:$0xff] %v6624_v56  ;;  %v3874_v7 = vcombine.high %v6618_v54, %v6624_v56  ;;  %v3875_v23 = vcombine.low %v6621_v29, %v6627_v5  ;;  %v7844_v20 = vcombine.low %v7842_v55, %v7843_v30  ;;  %v2536_v12 = vrot.slane %v2522_v61, %v5137_v33 }
 0x1bd   : > { %7837 = vst [vmem:[#allocation99_spill] sm:$0xff] %v6637_v0  ;;  %v2786_v34 = vcombine.high %v6634_v24, %v6637_v0  ;;  %v2633_v6 = vcombine.low %v2568_v62, %v2584_v52  ;;  %v2754_v10 = vcombine.high %v2697_v25, %v2713_v22  ;;  %v7847_v13 = vcombine.low %v5754_v59, %v7846_v19 }
 0x1be   : > { %v2601_v3 = vcombine.low %v2536_v12, %v2552_v45  ;;  %v7848_v25 = vcombine.low %v6282_v1, %v6315_v16  ;;  %v7942_v35 = vcombine.low %v7940_v43, %v7941_v47 }
 0x1bf   : > { %3903 = vrot.lane.b32.xlu1 %v2786_v34, %s4880_s17  ;;  %3965 = vrot.lane.b32.xlu0 %v2652_v51, %s4882_s27  ;;  %v2722_v34 = vcombine.high %v6591_v31, %v6588_v9  ;;  %v7845_v51 = vcombine.low %v5959_v49, %v6011_v50  ;;  %v2768_v36 = vrot.slane %v2754_v10, %v5198_v41 }
 0x1c0   : > { %v2641_v61 = vrot.slane %v2633_v6, %v5198_v41  ;;  %v7849_v31 = vcombine.low %v6147_v17, %v6175_v21  ;;  %v2609_v22 = vrot.slane %v2601_v3, %v5198_v41  ;;  %v7850_v6 = vcombine.high %v5503_v27, %v7840_v63 }
 0x1c1   : > { %v2736_v9 = vrot.slane %v2722_v34, %v5198_v41  ;;  %v7851_v10 = vcombine.high %v7842_v55, %v7843_v30  ;;  %v7852_v3 = vcombine.high %v5959_v49, %v6011_v50  ;;  %v7853_v34 = vcombine.high %v5754_v59, %v7846_v19 }
 0x1c2   : > { %v7854_v27 = vcombine.high %v6282_v1, %v6315_v16  ;;  %v7855_v63 = vcombine.high %v6147_v17, %v6175_v21  ;;  %v2706_v55 = vcombine.high %v6593_v15, %v6597_v2  ;;  %v2654_v50 = vcombine.high %v2609_v22, %v2641_v61  ;;  %v7856_v15 = vld [vmem:[#allocation23_spill] sm:$0xff]  ;;  %v7857_v2 = vld [vmem:[#allocation29_spill] sm:$0xff] }
 0x1c3   : > { %3923 = vrot.lane.b32.xlu1 %v7841_v44, %s4881_s25  ;;  %3985 = vrot.lane.b32.xlu0 %v7844_v20, %s4883_s28  ;;  %v2787_v44 = vcombine.low %v2736_v9, %v2768_v36  ;;  %v2653_v20 = vcombine.low %v2609_v22, %v2641_v61  ;;  %v2788_v49 = vcombine.high %v2736_v9, %v2768_v36 }
 0x1c4   : > { %v2674_v30 = vcombine.high %v6568_v53, %v6554_v39  ;;  %v2690_v59 = vcombine.high %v6585_v40, %v6581_v28  ;;  %v2658_v1 = vcombine.high %v6572_v4, %v6557_v18  ;;  %v2720_v17 = vrot.slane %v2706_v55, %v5137_v33  ;;  %v7859_v40 = vld [vmem:[#allocation12_spill] sm:$0xff]  ;;  %v7860_v53 = vld [vmem:[#allocation13_spill] sm:$0xff] }
 0x1c5   : > { %v7858_v39 = vcombine.low %v7856_v15, %v7857_v2  ;;  %v7861_v28 = vcombine.low %v7859_v40, %v7860_v53  ;;  %v2602_v19 = vcombine.high %v2536_v12, %v2552_v45  ;;  %v7862_v36 = vcombine.low %v5962_v26, %v6014_v11  ;;  %v7867_v45 = vld [vmem:[#allocation64_spill] sm:$0xff]  ;;  %v7868_v12 = vld [vmem:[#allocation70_spill] sm:$0xff] }
 0x1c6   : > { %v2688_v21 = vrot.slane %v2674_v30, %v5137_v33  ;;  %v2704_v16 = vrot.slane %v2690_v59, %v5137_v33  ;;  %v2672_v18 = vrot.slane %v2658_v1, %v5137_v33  ;;  %v7863_v61 = vcombine.low %v5760_v8, %v5786_v48  ;;  %v7865_v33 = vld [vmem:[#allocation82_spill] sm:$0xff]  ;;  %v7879_v30 = vld [vmem:[#allocation17_spill] sm:$0xff] }
 0x1c7   : > { %3927 = vrot.lane.b32.xlu1 %v7845_v51, %s4881_s25  ;;  %3989 = vrot.lane.b32.xlu0 %v7847_v13, %s4883_s28  ;;  %v2634_v51 = vcombine.high %v2568_v62, %v2584_v52  ;;  %v7864_v52 = vld [vmem:[#allocation76_spill] sm:$0xff]  ;;  %v7869_v9 = vcombine.low %v7867_v45, %v7868_v12  ;;  %v7875_v55 = vcombine.high %v7867_v45, %v7868_v12  ;;  %v7880_v59 = vld [vmem:[#allocation14_spill] sm:$0xff] }
 0x1c8   : > { %v2769_v4 = vcombine.low %v2704_v16, %v2720_v17  ;;  %v2737_v13 = vcombine.low %v2672_v18, %v2688_v21  ;;  %v7866_v62 = vcombine.low %v7864_v52, %v7865_v33  ;;  %v7881_v1 = vcombine.high %v7879_v30, %v7880_v59 }
 0x1ca   : > { %v2745_v22 = vrot.slane %v2737_v13, %v5198_v41 }
 0x1cb   : > { %3931 = vrot.lane.b32.xlu1 %v7848_v25, %s4881_s25  ;;  %3993 = vrot.lane.b32.xlu0 %v7849_v31, %s4883_s28  ;;  %v2777_v25 = vrot.slane %v2769_v4, %v5198_v41  ;;  %v2648_v31 = vrot.slane %v2634_v51, %v5198_v41  ;;  %v7886_v51 = vld [vmem:[#allocation42_spill] sm:$0xff] }
 0x1cf   : > { %3935 = vrot.lane.b32.xlu1 %v2787_v44, %s4881_s25  ;;  %3997 = vrot.lane.b32.xlu0 %v2653_v20, %s4883_s28  ;;  %v2616_v44 = vrot.slane %v2602_v19, %v5198_v41  ;;  %v2789_v20 = vcombine.low %v2745_v22, %v2777_v25 }
 0x1d3   : > { %3955 = vrot.lane.b32.xlu1 %v7850_v6, %s4882_s27  ;;  %4017 = vrot.lane.b32.xlu0 %v7851_v10, %s4884_s29  ;;  %v2655_v6 = vcombine.low %v2616_v44, %v2648_v31  ;;  %v7870_v10 = vcombine.high %v7856_v15, %v7857_v2  ;;  %v2770_v15 = vcombine.high %v2704_v16, %v2720_v17  ;;  %v7891_v17 = vld [vmem:[#allocation60_spill] sm:$0xff] }
 0x1d4   : > { %v2738_v2 = vcombine.high %v2672_v18, %v2688_v21  ;;  %v7892_v21 = vld [vmem:[#allocation66_spill] sm:$0xff] }
 0x1d5   : > { %v2784_v13 = vrot.slane %v2770_v15, %v5198_v41  ;;  %v7893_v16 = vcombine.high %v7891_v17, %v7892_v21 }
 0x1d6   : > { %v2752_v18 = vrot.slane %v2738_v2, %v5198_v41  ;;  %v6891_v2 = vpop.permute.xlu1 %3891 }
 0x1d7   : > { %3959 = vrot.lane.b32.xlu1 %v7852_v3, %s4882_s27  ;;  %4021 = vrot.lane.b32.xlu0 %v7853_v34, %s4884_s29  ;;  %v7871_v3 = vcombine.high %v7859_v40, %v7860_v53  ;;  %v7872_v34 = vcombine.high %v5962_v26, %v6014_v11  ;;  %v6819_v26 = vpop.permute.xlu0 %3889  ;;  %v7883_v40 = vld [vmem:[#allocation57_spill] sm:$0xff] }
 0x1db   : > { %3963 = vrot.lane.b32.xlu1 %v7854_v27, %s4882_s27  ;;  %4025 = vrot.lane.b32.xlu0 %v7855_v63, %s4884_s29  ;;  %v7873_v27 = vcombine.high %v5760_v8, %v5786_v48  ;;  %v7874_v63 = vcombine.high %v7864_v52, %v7865_v33  ;;  %v7876_v8 = vld [vmem:[#allocation24_spill] sm:$0xff]  ;;  %v7877_v48 = vld [vmem:[#allocation30_spill] sm:$0xff]  ;;  %v6837_v19 = vpop.permute.xlu0 %3893  ;;  %v2791_v52 = vcombine.low %v2752_v18, %v2784_v13 }
 0x1dc   : > { %v7878_v11 = vcombine.low %v7876_v8, %v7877_v48  ;;  %v7894_v33 = vld [vmem:[#allocation88_spill] sm:$0xff]  ;;  %v7896_v12 = vcombine.high %v7876_v8, %v7877_v48  ;;  %v2792_v8 = vcombine.high %v2752_v18, %v2784_v13  ;;  %v7908_v48 = vld [vmem:[#allocation87_spill] sm:$0xff]  ;;  %v6911_v18 = vpop.permute.xlu1 %3895 }
 0x1df   : > { %3967 = vrot.lane.b32.xlu1 %v2788_v49, %s4882_s27  ;;  %4029 = vrot.lane.b32.xlu0 %v2654_v50, %s4884_s29  ;;  %v2790_v49 = vcombine.high %v2745_v22, %v2777_v25  ;;  %v2656_v50 = vcombine.high %v2616_v44, %v2648_v31  ;;  %v6849_v31 = vpop.permute.xlu0 %3897  ;;  %v7898_v22 = vld [vmem:[#allocation15_spill] sm:$0xff] }
 0x1e3   : > { %3987 = vrot.lane.b32.xlu1 %v7858_v39, %s4883_s28  ;;  %4049 = vrot.lane.b32.xlu0 %v7861_v28, %s4885_s2  ;;  %v7882_v39 = vld [vmem:[#allocation49_spill] sm:$0xff]  ;;  %v7885_v28 = vld [vmem:[#allocation38_spill] sm:$0xff] }
 0x1e4   : > { %v7884_v53 = vcombine.low %v7882_v39, %v7883_v40  ;;  %v7887_v4 = vcombine.high %v7885_v28, %v7886_v51 }
 0x1e7   : > { %3991 = vrot.lane.b32.xlu1 %v7862_v36, %s4883_s28  ;;  %4053 = vrot.lane.b32.xlu0 %v7863_v61, %s4885_s2  ;;  %v7888_v36 = vld [vmem:[#allocation77_spill] sm:$0xff]  ;;  %v7889_v61 = vld [vmem:[#allocation84_spill] sm:$0xff] }
 0x1e8   : > { %v7890_v25 = vcombine.low %v7888_v36, %v7889_v61 }
 0x1eb   : > { %3995 = vrot.lane.b32.xlu1 %v7866_v62, %s4883_s28  ;;  %4057 = vrot.lane.b32.xlu0 %v7869_v9, %s4885_s2  ;;  %v7895_v62 = vcombine.high %v6451_v58, %v7894_v33  ;;  %v7897_v9 = vld [vmem:[#allocation18_spill] sm:$0xff] }
 0x1ec   : > { %v7899_v41 = vcombine.low %v7897_v9, %v7898_v22 }
 0x1ef   : > { %3999 = vrot.lane.b32.xlu1 %v2789_v20, %s4883_s28  ;;  %4061 = vrot.lane.b32.xlu0 %v2655_v6, %s4885_s2  ;;  %v7900_v20 = vcombine.high %v7882_v39, %v7883_v40  ;;  %v7901_v6 = vld [vmem:[#allocation39_spill] sm:$0xff]  ;;  %v7911_v39 = vld [vmem:[#allocation25_spill] sm:$0xff] }
 0x1f0   : > { %v7912_v40 = vld [vmem:[#allocation31_spill] sm:$0xff] }
 0x1f3   : > { %4019 = vrot.lane.b32.xlu1 %v7870_v10, %s4884_s29  ;;  %4081 = vrot.lane.b32.xlu0 %v7871_v3, %s4886_s3  ;;  %v7902_v10 = vld [vmem:[#allocation44_spill] sm:$0xff] }
 0x1f4   : > { %v7903_v3 = vcombine.low %v7901_v6, %v7902_v10 }
 0x1f7   : > { %4023 = vrot.lane.b32.xlu1 %v7872_v34, %s4884_s29  ;;  %4085 = vrot.lane.b32.xlu0 %v7873_v27, %s4886_s3  ;;  %v7904_v27 = vcombine.high %v7888_v36, %v7889_v61  ;;  %v7915_v36 = vld [vmem:[#allocation50_spill] sm:$0xff] }
 0x1f8   : > { %v7916_v61 = vld [vmem:[#allocation54_spill] sm:$0xff] }
 0x1fb   : > { %4027 = vrot.lane.b32.xlu1 %v7874_v63, %s4884_s29  ;;  %4089 = vrot.lane.b32.xlu0 %v7875_v55, %s4886_s3  ;;  %v7905_v63 = vld [vmem:[#allocation61_spill] sm:$0xff]  ;;  %v7906_v55 = vld [vmem:[#allocation67_spill] sm:$0xff] }
 0x1ff   : > { %4031 = vrot.lane.b32.xlu1 %v2790_v49, %s4884_s29  ;;  %4093 = vrot.lane.b32.xlu0 %v2656_v50, %s4886_s3  ;;  %v7907_v49 = vcombine.low %v7905_v63, %v7906_v55 }
 0x203   : > { %4051 = vrot.lane.b32.xlu1 %v7878_v11, %s4885_s2  ;;  %4113 = vrot.lane.b32.xlu0 %v7881_v1, %s4880_s17  ;;  %v7909_v11 = vld [vmem:[#allocation89_spill] sm:$0xff] }
 0x204   : > { %v7910_v1 = vcombine.low %v7908_v48, %v7909_v11 }
 0x207   : > { %4055 = vrot.lane.b32.xlu1 %v7884_v53, %s4885_s2  ;;  %4117 = vrot.lane.b32.xlu0 %v7887_v4, %s4880_s17  ;;  %v7913_v53 = vcombine.high %v7911_v39, %v7912_v40  ;;  %v7914_v4 = vcombine.high %v7897_v9, %v7898_v22  ;;  %v7922_v22 = vcombine.high %v7905_v63, %v7906_v55  ;;  %v7926_v63 = vld [vmem:[#allocation33_spill] sm:$0xff] }
 0x20b   : > { %4059 = vrot.lane.b32.xlu1 %v7890_v25, %s4885_s2  ;;  %4121 = vrot.lane.b32.xlu0 %v7893_v16, %s4880_s17  ;;  %v7917_v25 = vcombine.high %v7915_v36, %v7916_v61  ;;  %v7918_v16 = vcombine.high %v7901_v6, %v7902_v10  ;;  %v7923_v6 = vcombine.high %v7908_v48, %v7909_v11  ;;  %v7931_v48 = vld [vmem:[#allocation51_spill] sm:$0xff] }
 0x20c   : > { %v7932_v11 = vld [vmem:[#allocation55_spill] sm:$0xff] }
 0x20d   : > { %v7976_v61 = vld [vmem:[#allocation71_spill] sm:$0xff] }
 0x20f   : > { %4063 = vrot.lane.b32.xlu1 %v2791_v52, %s4885_s2  ;;  %4125 = vrot.lane.b32.xlu0 %v7895_v62, %s4880_s17  ;;  %v7919_v62 = vld [vmem:[#allocation72_spill] sm:$0xff] }
 0x211   : > { %v3902_v45 = vpop.permute.xlu0 %3901 }
 0x213   : > { %4083 = vrot.lane.b32.xlu1 %v7896_v12, %s4886_s3  ;;  %4145 = vrot.lane.b32.xlu0 %v7899_v41, %s4881_s25  ;;  %v7920_v12 = vld [vmem:[#allocation78_spill] sm:$0xff]  ;;  %v6923_v41 = vpop.permute.xlu1 %3899 }
 0x214   : > { %v7921_v9 = vcombine.high %v7919_v62, %v7920_v12 }
 0x215   : > { %v6864_v44 = vpop.permute.xlu0 %3921 }
 0x217   : > { %4087 = vrot.lane.b32.xlu1 %v7900_v20, %s4886_s3  ;;  %4149 = vrot.lane.b32.xlu0 %v7903_v3, %s4881_s25 }
 0x219   : > { %v6874_v34 = vpop.permute.xlu0 %3925 }
 0x21b   : > { %4091 = vrot.lane.b32.xlu1 %v7904_v27, %s4886_s3  ;;  %4153 = vrot.lane.b32.xlu0 %v7907_v49, %s4881_s25  ;;  %v7925_v27 = vld [vmem:[#allocation26_spill] sm:$0xff]  ;;  %v7928_v49 = vld [vmem:[#allocation19_spill] sm:$0xff] }
 0x21c   : > { %v7927_v55 = vcombine.low %v7925_v27, %v7926_v63 }
 0x21d   : > { %v6884_v50 = vpop.permute.xlu0 %3929 }
 0x21f   : > { %4095 = vrot.lane.b32.xlu1 %v2792_v8, %s4886_s3  ;;  %4157 = vrot.lane.b32.xlu0 %v7910_v1, %s4881_s25  ;;  %v7929_v8 = vld [vmem:[#allocation16_spill] sm:$0xff] }
 0x220   : > { %v7930_v1 = vcombine.low %v7928_v49, %v7929_v8  ;;  %v7948_v54 = vcombine.high %v7928_v49, %v7929_v8  ;;  %v7952_v49 = vcombine.high %v7940_v43, %v7941_v47 }
 0x221   : > { %v3934_v15 = vpop.permute.xlu0 %3933 }
 0x223   : > { %4115 = vrot.lane.b32.xlu1 %v7913_v53, %s4880_s17  ;;  %4177 = vrot.lane.b32.xlu0 %v7914_v4, %s4882_s27  ;;  %v7933_v4 = vcombine.low %v7931_v48, %v7932_v11 }
 0x225   : > { %v6901_v13 = vpop.permute.xlu0 %3953 }
 0x227   : > { %4119 = vrot.lane.b32.xlu1 %v7917_v25, %s4880_s17  ;;  %4181 = vrot.lane.b32.xlu0 %v7918_v16, %s4882_s27  ;;  %v7934_v25 = vld [vmem:[#allocation43_spill] sm:$0xff]  ;;  %v7935_v16 = vld [vmem:[#allocation45_spill] sm:$0xff] }
 0x228   : > { %v7950_v62 = vcombine.high %v7934_v25, %v7935_v16 }
 0x229   : > { %v6913_v52 = vpop.permute.xlu0 %3957 }
 0x22b   : > { %4123 = vrot.lane.b32.xlu1 %v7921_v9, %s4880_s17  ;;  %4185 = vrot.lane.b32.xlu0 %v7922_v22, %s4882_s27  ;;  %v7936_v9 = vcombine.low %v7934_v25, %v7935_v16 }
 0x22d   : > { %v6925_v20 = vpop.permute.xlu0 %3961 }
 0x22f   : > { %4127 = vrot.lane.b32.xlu1 %v3874_v7, %s4880_s17  ;;  %4189 = vrot.lane.b32.xlu0 %v7923_v6, %s4882_s27 }
 0x231   : > { %v6935_v10 = vpop.permute.xlu1 %3903  ;;  %v3966_v3 = vpop.permute.xlu0 %3965 }
 0x232   : > { %7924 = vst [vmem:[#allocation28_spill] sm:$0xff] %v6935_v10 }
 0x233   : > { %4147 = vrot.lane.b32.xlu1 %v7927_v55, %s4881_s25  ;;  %4209 = vrot.lane.b32.xlu0 %v7930_v1, %s4883_s28  ;;  %v7937_v55 = vld [vmem:[#allocation73_spill] sm:$0xff]  ;;  %v7938_v1 = vld [vmem:[#allocation79_spill] sm:$0xff] }
 0x234   : > { %v7939_v57 = vcombine.low %v7937_v55, %v7938_v1 }
 0x235   : > { %v6945_v53 = vpop.permute.xlu1 %3923  ;;  %v6947_v7 = vpop.permute.xlu0 %3985 }
 0x237   : > { %4151 = vrot.lane.b32.xlu1 %v7933_v4, %s4881_s25  ;;  %4213 = vrot.lane.b32.xlu0 %v7936_v9, %s4883_s28  ;;  %v7943_v9 = vld [vmem:[#allocation92_spill] sm:$0xff] }
 0x238   : > { %v7945_v32 = vcombine.low %v7943_v9, %v7944_v37  ;;  %v7957_v43 = vcombine.high %v7943_v9, %v7944_v37  ;;  %v7963_v37 = vld [vmem:[#allocation21_spill] sm:$0xff]  ;;  %v7964_v9 = vld [vmem:[#allocation20_spill] sm:$0xff] }
 0x239   : > { %v6957_v22 = vpop.permute.xlu1 %3927  ;;  %v6959_v6 = vpop.permute.xlu0 %3989  ;;  %v7985_v10 = vcombine.high %v7963_v37, %v7964_v9 }
 0x23b   : > { %4155 = vrot.lane.b32.xlu1 %v7939_v57, %s4881_s25  ;;  %4217 = vrot.lane.b32.xlu0 %v7942_v35, %s4883_s28  ;;  %v7947_v35 = vcombine.high %v7925_v27, %v7926_v63 }
 0x23d   : > { %v6969_v4 = vpop.permute.xlu1 %3931  ;;  %v6971_v42 = vpop.permute.xlu0 %3993 }
 0x23f   : > { %4159 = vrot.lane.b32.xlu1 %v3875_v23, %s4881_s25  ;;  %4221 = vrot.lane.b32.xlu0 %v7945_v32, %s4883_s28  ;;  %v7949_v32 = vcombine.high %v7931_v48, %v7932_v11  ;;  %v7954_v11 = vld [vmem:[#allocation91_spill] sm:$0xff] }
 0x241   : > { %v6981_v57 = vpop.permute.xlu1 %3935  ;;  %v3998_v56 = vpop.permute.xlu0 %3997 }
 0x242   : > { %7946 = vst [vmem:[#allocation9_spill] sm:$0xff] %v6981_v57  ;;  %v7980_v57 = vld [vmem:[#allocation95_spill] sm:$0xff] }
 0x243   : > { %4179 = vrot.lane.b32.xlu1 %v7947_v35, %s4882_s27  ;;  %4241 = vrot.lane.b32.xlu0 %v7948_v54, %s4884_s29  ;;  %v7951_v54 = vcombine.high %v7937_v55, %v7938_v1  ;;  %v7956_v55 = vcombine.high %v6621_v29, %v6627_v5  ;;  %v7960_v29 = vld [vmem:[#allocation32_spill] sm:$0xff]  ;;  %v7961_v5 = vld [vmem:[#allocation34_spill] sm:$0xff] }
 0x245   : > { %v6991_v12 = vpop.permute.xlu1 %3955  ;;  %v6993_v23 = vpop.permute.xlu0 %4017 }
 0x247   : > { %4183 = vrot.lane.b32.xlu1 %v7949_v32, %s4882_s27  ;;  %4245 = vrot.lane.b32.xlu0 %v7950_v62, %s4884_s29  ;;  %v7953_v62 = vld [vmem:[#allocation90_spill] sm:$0xff] }
 0x248   : > { %v7955_v25 = vcombine.low %v7953_v62, %v7954_v11  ;;  %v7966_v62 = vld [vmem:[#allocation52_spill] sm:$0xff]  ;;  %v7967_v11 = vld [vmem:[#allocation58_spill] sm:$0xff] }
 0x249   : > { %v7003_v27 = vpop.permute.xlu1 %3959  ;;  %v7005_v63 = vpop.permute.xlu0 %4021 }
 0x24a   : > { %v4336_v16 = vsel %vm4329_vm0, %v7955_v25, %v3902_v45  ;;  %v7968_v25 = vcombine.low %v7966_v62, %v7967_v11 }
 0x24b   : > { %4187 = vrot.lane.b32.xlu1 %v7951_v54, %s4882_s27  ;;  %4249 = vrot.lane.b32.xlu0 %v7952_v49, %s4884_s29  ;;  %v4345_v35 = vsel %vm4338_vm1, %v4336_v16, %v3934_v15  ;;  %v7962_v54 = vcombine.low %v7960_v29, %v7961_v5  ;;  %v7965_v49 = vcombine.low %v7963_v37, %v7964_v9  ;;  %v7969_v16 = vld [vmem:[#allocation46_spill] sm:$0xff] }
 0x24c   : > { %v4354_v47 = vsel %vm4347_vm2, %v4345_v35, %v3966_v3  ;;  %v7970_v35 = vld [vmem:[#allocation47_spill] sm:$0xff] }
 0x24d   : > { %v7015_v8 = vpop.permute.xlu1 %3963  ;;  %v7017_v48 = vpop.permute.xlu0 %4025  ;;  %v4363_v1 = vsel %vm4356_vm3, %v4354_v47, %v3998_v56 }
 0x24f   : > { %4191 = vrot.lane.b32.xlu1 %v7956_v55, %s4882_s27  ;;  %4253 = vrot.lane.b32.xlu0 %v7957_v43, %s4884_s29  ;;  %v7971_v55 = vcombine.low %v7969_v16, %v7970_v35 }
 0x251   : > { %v7034_v45 = vpop.permute.xlu1 %3967  ;;  %v4030_v15 = vpop.permute.xlu0 %4029 }
 0x252   : > { %7958 = vst [vmem:[#allocation11_spill] sm:$0xff] %v7034_v45  ;;  %v7037_v32 = vsel %vm4365_vm4, %v4363_v1, %v4030_v15  ;;  %v7972_v1 = vld [vmem:[#allocation74_spill] sm:$0xff]  ;;  %v7973_v15 = vld [vmem:[#allocation83_spill] sm:$0xff] }
 0x253   : > { %7959 = vst [vmem:[#allocation41_spill] sm:$0xff] %v7037_v32  ;;  %4211 = vrot.lane.b32.xlu1 %v7962_v54, %s4883_s28  ;;  %4273 = vrot.lane.b32.xlu0 %v7965_v49, %s4885_s2  ;;  %v7974_v54 = vcombine.low %v7972_v1, %v7973_v15  ;;  %v7975_v49 = vld [vmem:[#allocation65_spill] sm:$0xff]  ;;  %v7979_v32 = vld [vmem:[#allocation94_spill] sm:$0xff] }
 0x254   : > { %v7977_v36 = vcombine.low %v7975_v49, %v7976_v61  ;;  %v7981_v0 = vcombine.low %v7979_v32, %v7980_v57  ;;  %v7989_v37 = vcombine.high %v7975_v49, %v7976_v61 }
 0x255   : > { %v7047_v3 = vpop.permute.xlu1 %3987  ;;  %v4050_v56 = vpop.permute.xlu0 %4049 }
 0x257   : > { %4215 = vrot.lane.b32.xlu1 %v7968_v25, %s4883_s28  ;;  %4277 = vrot.lane.b32.xlu0 %v7971_v55, %s4885_s2  ;;  %v7978_v55 = vcombine.low %v6643_v38, %v6646_v60 }
 0x259   : > { %v7057_v43 = vpop.permute.xlu1 %3991  ;;  %v7059_v47 = vpop.permute.xlu0 %4053 }
 0x25b   : > { %4219 = vrot.lane.b32.xlu1 %v7974_v54, %s4883_s28  ;;  %4281 = vrot.lane.b32.xlu0 %v7977_v36, %s4885_s2  ;;  %v7984_v36 = vcombine.high %v7960_v29, %v7961_v5 }
 0x25d   : > { %v7069_v25 = vpop.permute.xlu1 %3995  ;;  %v7071_v45 = vpop.permute.xlu0 %4057 }
 0x25f   : > { %4223 = vrot.lane.b32.xlu1 %v7978_v55, %s4883_s28  ;;  %4285 = vrot.lane.b32.xlu0 %v7981_v0, %s4885_s2  ;;  %v7986_v0 = vcombine.high %v7966_v62, %v7967_v11  ;;  %v7990_v11 = vcombine.high %v6643_v38, %v6646_v60 }
 0x261   : > { %v7081_v54 = vpop.permute.xlu1 %3999  ;;  %v7083_v24 = vpop.permute.xlu0 %4061 }
 0x262   : > { %7982 = vst [vmem:[#allocation23_spill] sm:$0xff] %v7081_v54  ;;  %7983 = vst [vmem:[#allocation29_spill] sm:$0xff] %v7083_v24  ;;  %v7987_v54 = vcombine.high %v7969_v16, %v7970_v35  ;;  %v7991_v16 = vcombine.high %v7979_v32, %v7980_v57  ;;  %v7997_v57 = vcombine.low %v7879_v30, %v7880_v59  ;;  %v8002_v30 = vld [vmem:[#allocation80_spill] sm:$0xff]  ;;  %v8003_v59 = vld [vmem:[#allocation85_spill] sm:$0xff] }
 0x263   : > { %4243 = vrot.lane.b32.xlu1 %v7984_v36, %s4884_s29  ;;  %4305 = vrot.lane.b32.xlu0 %v7985_v10, %s4886_s3  ;;  %v7988_v10 = vcombine.high %v7972_v1, %v7973_v15  ;;  %v7994_v1 = vld [vmem:[#allocation35_spill] sm:$0xff]  ;;  %v7995_v15 = vld [vmem:[#allocation36_spill] sm:$0xff]  ;;  %v7998_v36 = vld [vmem:[#allocation53_spill] sm:$0xff] }
 0x264   : > { %v7996_v49 = vcombine.low %v7994_v1, %v7995_v15 }
 0x265   : > { %v4020_v55 = vpop.permute.xlu1 %4019  ;;  %v4082_v40 = vpop.permute.xlu0 %4081 }
 0x267   : > { %4247 = vrot.lane.b32.xlu1 %v7986_v0, %s4884_s29  ;;  %4309 = vrot.lane.b32.xlu0 %v7987_v54, %s4886_s3  ;;  %v4769_v54 = vld [vmem:[%s5010_s30] sm:$0xff]  ;;  %v7999_v0 = vld [vmem:[#allocation59_spill] sm:$0xff] }
 0x269   : > { %v7101_v29 = vpop.permute.xlu1 %4023  ;;  %v7103_v5 = vpop.permute.xlu0 %4085 }
 0x26b   : > { %4251 = vrot.lane.b32.xlu1 %v7988_v10, %s4884_s29  ;;  %4313 = vrot.lane.b32.xlu0 %v7989_v37, %s4886_s3  ;;  %v8000_v10 = vcombine.low %v7998_v36, %v7999_v0  ;;  %v4770_v37 = vld [vmem:[%s5010_s30 + $0x10] sm:$0xff] }
 0x26d   : > { %v7113_v9 = vpop.permute.xlu1 %4027  ;;  %v7115_v62 = vpop.permute.xlu0 %4089 }
 0x26f   : > { %4255 = vrot.lane.b32.xlu1 %v7990_v11, %s4884_s29  ;;  %4317 = vrot.lane.b32.xlu0 %v7991_v16, %s4886_s3 }
 0x271   : > { %v7125_v35 = vpop.permute.xlu1 %4031  ;;  %v7127_v61 = vpop.permute.xlu0 %4093 }
 0x272   : > { %7992 = vst [vmem:[#allocation12_spill] sm:$0xff] %v7125_v35  ;;  %7993 = vst [vmem:[#allocation13_spill] sm:$0xff] %v7127_v61  ;;  %v8006_v35 = vld [vmem:[#allocation10_spill] sm:$0xff] }
 0x273   : > { %4275 = vrot.lane.b32.xlu1 %v7996_v49, %s4885_s2  ;;  %4456 = vrot.lane.b32.xlu0 %v4769_v54, %s4887_s4  ;;  %v8001_v49 = vcombine.low %v7885_v28, %v7886_v51 }
 0x275   : > { %v4052_v38 = vpop.permute.xlu1 %4051  ;;  %v4114_v60 = vpop.permute.xlu0 %4113 }
 0x276   : > { %v4392_v32 = vsel %vm4329_vm0, %v7997_v57, %v4114_v60  ;;  %v8004_v60 = vcombine.low %v8002_v30, %v8003_v59  ;;  %v4771_v57 = vld [vmem:[%s5010_s30 + $0x20] sm:$0xff] }
 0x277   : > { %4279 = vrot.lane.b32.xlu1 %v8000_v10, %s4885_s2  ;;  %4460 = vrot.lane.b32.xlu0 %v4770_v37, %s4887_s4  ;;  %v8005_v10 = vld [vmem:[#allocation8_spill] sm:$0xff] }
 0x278   : > { %v8007_v37 = vcombine.low %v8005_v10, %v8006_v35 }
 0x279   : > { %v4056_v11 = vpop.permute.xlu1 %4055  ;;  %v4118_v16 = vpop.permute.xlu0 %4117 }
 0x27a   : > { %v4394_v54 = vsel %vm4329_vm0, %v8001_v49, %v4118_v16  ;;  %v4330_v61 = vsel %vm4329_vm0, %v8007_v37, %v6819_v26  ;;  %v8008_v49 = vcombine.low %v7891_v17, %v7892_v21  ;;  %v8009_v26 = vcombine.low %v6664_v46, %v6679_v14 }
 0x27b   : > { %4283 = vrot.lane.b32.xlu1 %v8004_v60, %s4885_s2  ;;  %4464 = vrot.lane.b32.xlu0 %v4771_v57, %s4887_s4  ;;  %v4339_v24 = vsel %vm4338_vm1, %v4330_v61, %v6864_v44  ;;  %v4772_v44 = vld [vmem:[%s5010_s30 + $0x30] sm:$0xff] }
 0x27c   : > { %v4348_v16 = vsel %vm4347_vm2, %v4339_v24, %v6901_v13  ;;  %v8010_v24 = vld [vmem:[#allocation22_spill] sm:$0xff]  ;;  %v8011_v13 = vld [vmem:[#allocation27_spill] sm:$0xff] }
 0x27d   : > { %v7162_v28 = vpop.permute.xlu1 %4059  ;;  %v4122_v51 = vpop.permute.xlu0 %4121  ;;  %v4357_v35 = vsel %vm4356_vm3, %v4348_v16, %v6947_v7  ;;  %v8012_v61 = vcombine.low %v8010_v24, %v8011_v13 }
 0x27e   : > { %v4396_v60 = vsel %vm4329_vm0, %v8008_v49, %v4122_v51  ;;  %v4366_v21 = vsel %vm4365_vm4, %v4357_v35, %v6993_v23  ;;  %v8013_v49 = vcombine.low %v6451_v58, %v7894_v33 }
 0x27f   : > { %4287 = vrot.lane.b32.xlu1 %v8009_v26, %s4885_s2  ;;  %4468 = vrot.lane.b32.xlu0 %v4772_v44, %s4887_s4  ;;  %v4331_v17 = vsel %vm4329_vm0, %v8012_v61, %v6891_v2  ;;  %v4375_v57 = vsel %vm4374_vm5, %v4366_v21, %v4050_v56  ;;  %v8016_v56 = vld [vmem:[#allocation40_spill] sm:$0xff] }
 0x280   : > { %v4340_v7 = vsel %vm4338_vm1, %v4331_v17, %v6945_v53  ;;  %v4384_v16 = vsel %vm4383_vm6, %v4375_v57, %v4082_v40  ;;  %v8014_v53 = vcombine.high %v7994_v1, %v7995_v15 }
 0x281   : > { %v7188_v10 = vpop.permute.xlu1 %4063  ;;  %v4126_v37 = vpop.permute.xlu0 %4125  ;;  %v4349_v51 = vsel %vm4347_vm2, %v4340_v7, %v6991_v12  ;;  %v8015_v12 = vld [vmem:[#allocation37_spill] sm:$0xff] }
 0x282   : > { %v4398_v2 = vsel %vm4329_vm0, %v8013_v49, %v4126_v37  ;;  %v4358_v23 = vsel %vm4356_vm3, %v4349_v51, %v7047_v3  ;;  %v8017_v40 = vcombine.low %v8015_v12, %v8016_v56  ;;  %v4773_v56 = vld [vmem:[%s5010_s30 + $0x8] sm:$0xff] }
 0x283   : > { %4307 = vrot.lane.b32.xlu1 %v8014_v53, %s4886_s3  ;;  %4496 = vrot.lane.b32.xlu0 %v4384_v16, %s4888_s5  ;;  %v4367_v58 = vsel %vm4365_vm4, %v4358_v23, %v4020_v55  ;;  %v8018_v55 = vcombine.high %v7998_v36, %v7999_v0 }
 0x284   : > { %v4332_v35 = vsel %vm4329_vm0, %v8017_v40, %v6837_v19  ;;  %v4376_v3 = vsel %vm4374_vm5, %v4367_v58, %v4052_v38  ;;  %v8020_v38 = vld [vmem:[#allocation56_spill] sm:$0xff]  ;;  %v4774_v58 = vld [vmem:[%s5010_s30 + $0x18] sm:$0xff] }
 0x285   : > { %v4341_v33 = vsel %vm4338_vm1, %v4332_v35, %v6874_v34  ;;  %v4084_v26 = vpop.permute.xlu1 %4083  ;;  %v4146_v44 = vpop.permute.xlu0 %4145  ;;  %v8019_v34 = vld [vmem:[#allocation48_spill] sm:$0xff] }
 0x286   : > { %v4350_v1 = vsel %vm4347_vm2, %v4341_v33, %v6913_v52  ;;  %v4385_v15 = vsel %vm4383_vm6, %v4376_v3, %v4084_v26  ;;  %v7217_v24 = vsel %vm4338_vm1, %v4392_v32, %v4146_v44  ;;  %v8021_v13 = vcombine.low %v8019_v34, %v8020_v38  ;;  %v8033_v33 = vld [vmem:[#allocation98_spill] sm:$0xff]  ;;  %v8034_v3 = vld [vmem:[#allocation99_spill] sm:$0xff]  ;;  %v8036_v44 = vld [vmem:[#allocation9_spill] sm:$0xff] }
 0x287   : > { %v4359_v19 = vsel %vm4356_vm3, %v4350_v1, %v6959_v6  ;;  %4311 = vrot.lane.b32.xlu1 %v8018_v55, %s4886_s3  ;;  %4500 = vrot.lane.b32.xlu0 %v4385_v15, %s4888_s5  ;;  %v8037_v15 = vld [vmem:[#allocation29_spill] sm:$0xff]  ;;  %v8039_v38 = vld [vmem:[#allocation11_spill] sm:$0xff] }
 0x288   : > { %v4333_v52 = vsel %vm4329_vm0, %v8021_v13, %v6911_v18  ;;  %v4368_v32 = vsel %vm4365_vm4, %v4359_v19, %v7005_v63  ;;  %v8023_v63 = vld [vmem:[#allocation63_spill] sm:$0xff]  ;;  %v8038_v19 = vld [vmem:[#allocation41_spill] sm:$0xff] }
 0x289   : > { %v4342_v61 = vsel %vm4338_vm1, %v4333_v52, %v6957_v22  ;;  %v4377_v6 = vsel %vm4374_vm5, %v4368_v32, %v7059_v47  ;;  %v4088_v17 = vpop.permute.xlu1 %4087  ;;  %v4150_v36 = vpop.permute.xlu0 %4149  ;;  %v8022_v22 = vcombine.high %v8002_v30, %v8003_v59  ;;  %v8024_v47 = vld [vmem:[#allocation68_spill] sm:$0xff]  ;;  %v8040_v52 = vld [vmem:[#allocation13_spill] sm:$0xff] }
 0x28a   : > { %v4351_v0 = vsel %vm4347_vm2, %v4342_v61, %v7003_v27  ;;  %v4386_v21 = vsel %vm4383_vm6, %v4377_v6, %v7103_v5  ;;  %v4402_v7 = vsel %vm4338_vm1, %v4394_v54, %v4150_v36  ;;  %v8025_v57 = vcombine.low %v8023_v63, %v8024_v47  ;;  %v8041_v61 = vld [vmem:[#allocation50_spill] sm:$0xff]  ;;  %v8045_v63 = vld [vmem:[#allocation12_spill] sm:$0xff] }
 0x28b   : > { %v4360_v18 = vsel %vm4356_vm3, %v4351_v0, %v7057_v43  ;;  %4315 = vrot.lane.b32.xlu1 %v8022_v22, %s4886_s3  ;;  %4504 = vrot.lane.b32.xlu0 %v4386_v21, %s4888_s5  ;;  %v8042_v6 = vld [vmem:[#allocation54_spill] sm:$0xff]  ;;  %v8044_v21 = vld [vmem:[#allocation23_spill] sm:$0xff]  ;;  %v4775_v22 = vld [vmem:[%s5010_s30 + $0x28] sm:$0xff]  ;;  %s4810_s30 = sshll.u32 %s4889_s26, 4  ;;  %s4811_s30 = int_to_ptr.vmem [resolvable:$false] %s4810_s30 }
 0x28c   : > { %v4334_v27 = vsel %vm4329_vm0, %v8025_v57, %v6849_v31  ;;  %v4369_v5 = vsel %vm4365_vm4, %v4360_v18, %v7101_v29  ;;  %v8026_v29 = vcombine.high %v6664_v46, %v6679_v14  ;;  %s4812_s17 = scalar_lea.vmem %s4811_s30, 6144  ;;  %p4813_p8 = scmp.lt.s32.totalorder %s7492_s16, %s4811_s30 }
 0x28d   : > { %v4343_v54 = vsel %vm4338_vm1, %v4334_v27, %v6884_v50  ;;  %v4378_v43 = vsel %vm4374_vm5, %v4369_v5, %v4056_v11  ;;  %v4092_v37 = vpop.permute.xlu1 %4091  ;;  %v4154_v51 = vpop.permute.xlu0 %4153  ;;  %v8027_v50 = vld [vmem:[#allocation75_spill] sm:$0xff]  ;;  %v8028_v11 = vld [vmem:[#allocation81_spill] sm:$0xff]  ;;  %p4814_p10 = scmp.lt.s32.totalorder %s4812_s17, %s4806_s24 }
 0x28e   : > { %v4352_v30 = vsel %vm4347_vm2, %v4343_v54, %v6925_v20  ;;  %v4387_v59 = vsel %vm4383_vm6, %v4378_v43, %v4088_v17  ;;  %v4404_v16 = vsel %vm4338_vm1, %v4396_v60, %v4154_v51  ;;  %v8029_v49 = vcombine.low %v8027_v50, %v8028_v11  ;;  %v8046_v43 = vld [vmem:[#allocation72_spill] sm:$0xff] }
 0x28f   : > { %v4361_v31 = vsel %vm4356_vm3, %v4352_v30, %v6971_v42  ;;  %4319 = vrot.lane.b32.xlu1 %v8026_v29, %s4886_s3  ;;  %4508 = vrot.lane.b32.xlu0 %v4387_v59, %s4888_s5  ;;  %v8043_v17 = vcombine.low %v8041_v61, %v8042_v6  ;;  %v8049_v59 = vld [vmem:[#allocation86_spill] sm:$0xff]  ;;  %v8050_v50 = vld [vmem:[#allocation96_spill] sm:$0xff]  ;;  %p4815_p0 = por %p4814_p10, %p4813_p8 }
 0x290   : > { %v4335_v20 = vsel %vm4329_vm0, %v8029_v49, %v6923_v41  ;;  %v4370_v23 = vsel %vm4365_vm4, %v4361_v31, %v7017_v48 }
 0x291   : > { %v4344_v60 = vsel %vm4338_vm1, %v4335_v20, %v6969_v4  ;;  %v4379_v42 = vsel %vm4374_vm5, %v4370_v23, %v7071_v45  ;;  %v4096_v46 = vpop.permute.xlu1 %4095  ;;  %v4158_v14 = vpop.permute.xlu0 %4157  ;;  %p4816_p2 = pnand %p4815_p0, %p4809_p13 }
 0x292   : > { %v4353_v53 = vsel %vm4347_vm2, %v4344_v60, %v7015_v8  ;;  %v4388_v12 = vsel %vm4383_vm6, %v4379_v42, %v7115_v62  ;;  %v4406_v41 = vsel %vm4338_vm1, %v4398_v2, %v4158_v14  ;;  %v8030_v2 = vld [vmem:[#allocation31_spill] sm:$0xff] }
 0x293   : > { %v4362_v48 = vsel %vm4356_vm3, %v4353_v53, %v7069_v25  ;;  %4458 = vrot.lane.b32.xlu1 %v4773_v56, %s4887_s4  ;;  %4512 = vrot.lane.b32.xlu0 %v4388_v12, %s4888_s5  ;;  %v8031_v25 = vcombine.low %v7911_v39, %v8030_v2  ;;  %v4381_v39 = vsel %vm4374_vm5, %v8038_v19, %v8037_v15 }
 0x294   : > { %v4371_v4 = vsel %vm4365_vm4, %v4362_v48, %v7113_v9  ;;  %v8032_v9 = vld [vmem:[#allocation28_spill] sm:$0xff]  ;;  %v4390_v32 = vsel %vm4383_vm6, %v4381_v39, %v8040_v52 }
 0x295   : > { %v4380_v45 = vsel %vm4374_vm5, %v4371_v4, %v7162_v28  ;;  %v4116_v8 = vpop.permute.xlu1 %4115  ;;  %v7295_v40 = vpop.permute.xlu0 %4177  ;;  %v8035_v28 = vcombine.low %v8033_v33, %v8034_v3 }
 0x296   : > { %v4389_v62 = vsel %vm4383_vm6, %v4380_v45, %v4092_v37  ;;  %v4393_v35 = vsel %vm4329_vm0, %v8031_v25, %v4116_v8  ;;  %v4408_v6 = vsel %vm4347_vm2, %v7217_v24, %v7295_v40 }
 0x297   : > { %4462 = vrot.lane.b32.xlu1 %v4774_v58, %s4887_s4  ;;  %4516 = vrot.lane.b32.xlu0 %v4389_v62, %s4888_s5  ;;  %v4337_v26 = vsel %vm4329_vm0, %v8035_v28, %v8032_v9 }
 0x298   : > { %v4346_v1 = vsel %vm4338_vm1, %v4337_v26, %v8036_v44 }
 0x299   : > { %v4120_v55 = vpop.permute.xlu1 %4119  ;;  %v4182_v34 = vpop.permute.xlu0 %4181  ;;  %v4355_v13 = vsel %vm4347_vm2, %v4346_v1, %v8039_v38 }
 0x29a   : > { %v4395_v36 = vsel %vm4329_vm0, %v8043_v17, %v4120_v55  ;;  %v4410_v0 = vsel %vm4347_vm2, %v4402_v7, %v4182_v34  ;;  %v4364_v18 = vsel %vm4356_vm3, %v4355_v13, %v8044_v21  ;;  %v8047_v7 = vld [vmem:[#allocation78_spill] sm:$0xff] }
 0x29b   : > { %4466 = vrot.lane.b32.xlu1 %v4775_v22, %s4887_s4  ;;  %4520 = vrot.lane.b32.xlu0 %v4390_v32, %s4888_s5  ;;  %v4373_v47 = vsel %vm4365_vm4, %v4364_v18, %v8045_v63  ;;  %v8048_v37 = vcombine.low %v8046_v43, %v8047_v7 }
 0x29c   : > { %v4382_v57 = vsel %vm4374_vm5, %v4373_v47, %v7188_v10  ;;  %v8051_v10 = vld [vmem:[#allocation97_spill] sm:$0xff] }
 0x29d   : > { %v4124_v27 = vpop.permute.xlu1 %4123  ;;  %v4186_v5 = vpop.permute.xlu0 %4185  ;;  %v4391_v54 = vsel %vm4383_vm6, %v4382_v57, %v4096_v46  ;;  %v8052_v11 = vcombine.low %v8050_v50, %v8051_v10 }
 0x29e   : > { %v4397_v51 = vsel %vm4329_vm0, %v8048_v37, %v4124_v27  ;;  %v4412_v30 = vsel %vm4347_vm2, %v4404_v16, %v4186_v5 }
 0x29f   : > { %4470 = vrot.lane.b32.xlu1 %v8049_v59, %s4887_s4  ;;  %4524 = vrot.lane.b32.xlu0 %v4391_v54, %s4888_s5 }
 0x2a1   : > { %v4128_v31 = vpop.permute.xlu1 %4127  ;;  %v4190_v29 = vpop.permute.xlu0 %4189 }
 0x2a2   : > { %v4399_v49 = vsel %vm4329_vm0, %v8052_v11, %v4128_v31  ;;  %v4414_v20 = vsel %vm4347_vm2, %v4406_v41, %v4190_v29 }
 0x2a5   : > { %v4148_v23 = vpop.permute.xlu1 %4147  ;;  %v4210_v60 = vpop.permute.xlu0 %4209 }
 0x2a6   : > { %v4401_v42 = vsel %vm4338_vm1, %v4393_v35, %v4148_v23  ;;  %v4416_v17 = vsel %vm4356_vm3, %v4408_v6, %v4210_v60 }
 0x2a9   : > { %v4152_v46 = vpop.permute.xlu1 %4151  ;;  %v4214_v16 = vpop.permute.xlu0 %4213 }
 0x2aa   : > { %v4403_v14 = vsel %vm4338_vm1, %v4395_v36, %v4152_v46  ;;  %v7350_v53 = vsel %vm4356_vm3, %v4410_v0, %v4214_v16 }
 0x2ad   : > { %v4156_v12 = vpop.permute.xlu1 %4155  ;;  %v4218_v48 = vpop.permute.xlu0 %4217 }
 0x2ae   : > { %v4405_v56 = vsel %vm4338_vm1, %v4397_v51, %v4156_v12  ;;  %v4420_v4 = vsel %vm4356_vm3, %v4412_v30, %v4218_v48 }
 0x2b1   : > { %v4160_v45 = vpop.permute.xlu1 %4159  ;;  %v4222_v8 = vpop.permute.xlu0 %4221 }
 0x2b2   : > { %v4407_v41 = vsel %vm4338_vm1, %v4399_v49, %v4160_v45  ;;  %v4422_v62 = vsel %vm4356_vm3, %v4414_v20, %v4222_v8 }
 0x2b5   : > { %v4180_v2 = vpop.permute.xlu1 %4179  ;;  %v4242_v25 = vpop.permute.xlu0 %4241 }
 0x2b6   : > { %v4424_v36 = vsel %vm4365_vm4, %v4416_v17, %v4242_v25  ;;  %v4409_v31 = vsel %vm4347_vm2, %v4401_v42, %v4180_v2 }
 0x2b9   : > { %v4184_v35 = vpop.permute.xlu1 %4183  ;;  %v4246_v58 = vpop.permute.xlu0 %4245 }
 0x2ba   : > { %v4411_v9 = vsel %vm4347_vm2, %v4403_v14, %v4184_v35  ;;  %v4426_v42 = vsel %vm4365_vm4, %v7350_v53, %v4246_v58 }
 0x2bd   : > { %v4188_v33 = vpop.permute.xlu1 %4187  ;;  %v4250_v3 = vpop.permute.xlu0 %4249 }
 0x2be   : > { %v7358_v28 = vsel %vm4347_vm2, %v4405_v56, %v4188_v33  ;;  %v7361_v26 = vsel %vm4365_vm4, %v4420_v4, %v4250_v3 }
 0x2c1   : > { %v4192_v44 = vpop.permute.xlu1 %4191  ;;  %v4254_v1 = vpop.permute.xlu0 %4253 }
 0x2c2   : > { %v7364_v15 = vsel %vm4347_vm2, %v4407_v41, %v4192_v44  ;;  %v7367_v19 = vsel %vm4365_vm4, %v4422_v62, %v4254_v1 }
 0x2c5   : > { %v4212_v39 = vpop.permute.xlu1 %4211  ;;  %v4274_v55 = vpop.permute.xlu0 %4273 }
 0x2c6   : > { %v4432_v0 = vsel %vm4374_vm5, %v4424_v36, %v4274_v55  ;;  %v4417_v29 = vsel %vm4356_vm3, %v4409_v31, %v4212_v39 }
 0x2c9   : > { %v4216_v34 = vpop.permute.xlu1 %4215  ;;  %v4278_v38 = vpop.permute.xlu0 %4277 }
 0x2ca   : > { %v4434_v46 = vsel %vm4374_vm5, %v4426_v42, %v4278_v38  ;;  %v4419_v48 = vsel %vm4356_vm3, %v4411_v9, %v4216_v34 }
 0x2cd   : > { %v4220_v13 = vpop.permute.xlu1 %4219  ;;  %v4282_v52 = vpop.permute.xlu0 %4281 }
 0x2ce   : > { %v4436_v2 = vsel %vm4374_vm5, %v7361_v26, %v4282_v52  ;;  %v4421_v9 = vsel %vm4356_vm3, %v7358_v28, %v4220_v13 }
 0x2d1   : > { %v7369_v32 = vpop.permute.xlu1 %4223  ;;  %v7371_v61 = vpop.permute.xlu0 %4285 }
 0x2d2   : > { %v4438_v38 = vsel %vm4374_vm5, %v7367_v19, %v7371_v61  ;;  %v4423_v36 = vsel %vm4356_vm3, %v7364_v15, %v7369_v32 }
 0x2d5   : > { %v4244_v21 = vpop.permute.xlu1 %4243  ;;  %v4306_v18 = vpop.permute.xlu0 %4305 }
 0x2d6   : > { %v4440_v22 = vsel %vm4383_vm6, %v4432_v0, %v4306_v18  ;;  %v4425_v10 = vsel %vm4365_vm4, %v4417_v29, %v4244_v21 }
 0x2d7   : > { %4498 = vrot.lane.b32.xlu1 %v4440_v22, %s4888_s5 }
 0x2d9   : > { %v4248_v63 = vpop.permute.xlu1 %4247  ;;  %v4310_v47 = vpop.permute.xlu0 %4309 }
 0x2da   : > { %v4442_v12 = vsel %vm4383_vm6, %v4434_v46, %v4310_v47  ;;  %v4427_v4 = vsel %vm4365_vm4, %v4419_v48, %v4248_v63 }
 0x2dd   : > { %v4252_v57 = vpop.permute.xlu1 %4251  ;;  %v4314_v27 = vpop.permute.xlu0 %4313 }
 0x2de   : > { %v4444_v58 = vsel %vm4383_vm6, %v4436_v2, %v4314_v27  ;;  %v4429_v3 = vsel %vm4365_vm4, %v4421_v9, %v4252_v57 }
 0x2e1   : > { %v7381_v5 = vpop.permute.xlu1 %4255  ;;  %v4318_v24 = vpop.permute.xlu0 %4317 }
 0x2e2   : > { %v4446_v6 = vsel %vm4383_vm6, %v4438_v38, %v4318_v24  ;;  %v4431_v19 = vsel %vm4365_vm4, %v4423_v36, %v7381_v5 }
 0x2e5   : > { %v4276_v40 = vpop.permute.xlu1 %4275  ;;  %v4457_v54 = vpop.permute.xlu0 %4456 }
 0x2e6   : > { %v4562_v50 = vsel %vm4561_vm7, 1.0, %v4457_v54  ;;  %v4433_v11 = vsel %vm4374_vm5, %v4425_v10, %v4276_v40 }
 0x2e9   : > { %v4280_v43 = vpop.permute.xlu1 %4279  ;;  %v4461_v7 = vpop.permute.xlu0 %4460 }
 0x2ea   : > { %v4564_v56 = vsel %vm4561_vm7, 1.0, %v4461_v7  ;;  %v4435_v45 = vsel %vm4374_vm5, %v4427_v4, %v4280_v43 }
 0x2ed   : > { %v4284_v37 = vpop.permute.xlu1 %4283  ;;  %v4465_v51 = vpop.permute.xlu0 %4464 }
 0x2ee   : > { %v4566_v33 = vsel %vm4561_vm7, 1.0, %v4465_v51  ;;  %v4437_v44 = vsel %vm4374_vm5, %v4429_v3, %v4284_v37 }
 0x2f1   : > { %v4288_v30 = vpop.permute.xlu1 %4287  ;;  %v4469_v59 = vpop.permute.xlu0 %4468 }
 0x2f2   : > { %v4568_v0 = vsel %vm4561_vm7, 1.0, %v4469_v59  ;;  %v4439_v61 = vsel %vm4374_vm5, %v4431_v19, %v4288_v30 }
 0x2f5   : > { %v4308_v49 = vpop.permute.xlu1 %4307  ;;  %v7389_v20 = vpop.permute.xlu0 %4496 }
 0x2f6   : > { %v4441_v23 = vsel %vm4383_vm6, %v4433_v11, %v4308_v49  ;;  %v4570_v60 = vsel %vm4528_vm8, %v4562_v50, %v7389_v20 }
 0x2f7   : > { %4578 = vst [vmem:[%s7394_s13] sm:$0xff] %v4570_v60  ;;  %4502 = vrot.lane.b32.xlu1 %v4441_v23, %s4888_s5 }
 0x2f9   : > { %v4312_v16 = vpop.permute.xlu1 %4311  ;;  %v7401_v14 = vpop.permute.xlu0 %4500 }
 0x2fa   : > { %v4443_v53 = vsel %vm4383_vm6, %v4435_v45, %v4312_v16 }
 0x2fb   : > { %4506 = vrot.lane.b32.xlu1 %v4442_v12, %s4888_s5 }
 0x2fd   : > { %v4316_v8 = vpop.permute.xlu1 %4315  ;;  %v4505_v41 = vpop.permute.xlu0 %4504 }
 0x2fe   : > { %v4572_v62 = vsel %vm4528_vm8, %v4564_v56, %v4505_v41  ;;  %v4445_v26 = vsel %vm4383_vm6, %v4437_v44, %v4316_v8 }
 0x2ff   : > { %4584 = vst [vmem:[%s7394_s13 + $0x30] sm:$0xff] %v4572_v62  ;;  %4510 = vrot.lane.b32.xlu1 %v4443_v53, %s4888_s5 }
 0x301   : > { %v4320_v25 = vpop.permute.xlu1 %4319  ;;  %v4509_v35 = vpop.permute.xlu0 %4508 }
 0x302   : > { %v4447_v63 = vsel %vm4383_vm6, %v4439_v61, %v4320_v25 }
 0x303   : > { %4514 = vrot.lane.b32.xlu1 %v4444_v58, %s4888_s5 }
 0x305   : > { %v4459_v1 = vpop.permute.xlu1 %4458  ;;  %v4513_v39 = vpop.permute.xlu0 %4512 }
 0x306   : > { %v4563_v55 = vsel %vm4561_vm7, 1.0, %v4459_v1  ;;  %v4574_v34 = vsel %vm4528_vm8, %v4566_v33, %v4513_v39 }
 0x307   : > { %v4571_v28 = vsel %vm4528_vm8, %v4563_v55, %v7401_v14  ;;  %4590 = vst [vmem:[%s7394_s13 + $0x60] sm:$0xff] %v4574_v34  ;;  %4518 = vrot.lane.b32.xlu1 %v4445_v26, %s4888_s5 }
 0x308   : > { %4581 = vst [vmem:[%s7394_s13 + $0x18] sm:$0xff] %v4571_v28 }
 0x309   : > { %v4463_v13 = vpop.permute.xlu1 %4462  ;;  %v4517_v52 = vpop.permute.xlu0 %4516 }
 0x30a   : > { %v4565_v17 = vsel %vm4561_vm7, 1.0, %v4463_v13 }
 0x30b   : > { %v4573_v21 = vsel %vm4528_vm8, %v4565_v17, %v4509_v35  ;;  %4522 = vrot.lane.b32.xlu1 %v4446_v6, %s4888_s5 }
 0x30c   : > { %4587 = vst [vmem:[%s7394_s13 + $0x48] sm:$0xff] %v4573_v21 }
 0x30d   : > { %v4467_v18 = vpop.permute.xlu1 %4466  ;;  %v4521_v22 = vpop.permute.xlu0 %4520 }
 0x30e   : > { %v4567_v15 = vsel %vm4561_vm7, 1.0, %v4467_v18  ;;  %v4576_v32 = vsel %vm4528_vm8, %v4568_v0, %v4521_v22 }
 0x30f   : > { %v4575_v47 = vsel %vm4528_vm8, %v4567_v15, %v4517_v52  ;;  %4596 = vst [vmem:[%s7394_s13 + $0x90] sm:$0xff] %v4576_v32  ;;  %4526 = vrot.lane.b32.xlu1 %v4447_v63, %s4888_s5 }
 0x310   : > { %4593 = vst [vmem:[%s7394_s13 + $0x78] sm:$0xff] %v4575_v47 }
 0x311   : > { %v4471_v57 = vpop.permute.xlu1 %4470  ;;  %v4525_v27 = vpop.permute.xlu0 %4524 }
 0x312   : > { %v4569_v5 = vsel %vm4561_vm7, 1.0, %v4471_v57 }
 0x313   : > { %v4577_v24 = vsel %vm4528_vm8, %v4569_v5, %v4525_v27 }
 0x314   : > { %4599 = vst [vmem:[%s7394_s13 + $0xa8] sm:$0xff] %v4577_v24 }
 0x349   : > { %v4499_v40 = vpop.permute.xlu1 %4498 }
 0x34a   : > { %v4529_v54 = vsel %vm4528_vm8, %v7389_v20, %v4499_v40  ;;  %4580 = vst.msk [vmem:[%s7394_s13 + $0x10] sm:$0xff] %vm4528_vm8, %v4499_v40 }
 0x34b   : > { %4579 = vst [vmem:[%s7394_s13 + $0x8] sm:$0xff] %v4529_v54 }
 0x369   : > { %v4503_v43 = vpop.permute.xlu1 %4502 }
 0x36a   : > { %v4530_v7 = vsel %vm4528_vm8, %v7401_v14, %v4503_v43  ;;  %4583 = vst.msk [vmem:[%s7394_s13 + $0x28] sm:$0xff] %vm4528_vm8, %v4503_v43 }
 0x36b   : > { %4582 = vst [vmem:[%s7394_s13 + $0x20] sm:$0xff] %v4530_v7 }
 0x36d   : > { %v4507_v37 = vpop.permute.xlu1 %4506 }
 0x36e   : > { %v4531_v51 = vsel %vm4528_vm8, %v4505_v41, %v4507_v37  ;;  %4586 = vst.msk [vmem:[%s7394_s13 + $0x40] sm:$0xff] %vm4528_vm8, %v4507_v37 }
 0x36f   : > { %4585 = vst [vmem:[%s7394_s13 + $0x38] sm:$0xff] %v4531_v51 }
 0x371   : > { %v4511_v30 = vpop.permute.xlu1 %4510 }
 0x372   : > { %v4532_v59 = vsel %vm4528_vm8, %v4509_v35, %v4511_v30  ;;  %4589 = vst.msk [vmem:[%s7394_s13 + $0x58] sm:$0xff] %vm4528_vm8, %v4511_v30 }
 0x373   : > { %4588 = vst [vmem:[%s7394_s13 + $0x50] sm:$0xff] %v4532_v59 }
 0x375   : > { %v4515_v31 = vpop.permute.xlu1 %4514 }
 0x376   : > { %v4533_v29 = vsel %vm4528_vm8, %v4513_v39, %v4515_v31  ;;  %4592 = vst.msk [vmem:[%s7394_s13 + $0x70] sm:$0xff] %vm4528_vm8, %v4515_v31 }
 0x377   : > { %4591 = vst [vmem:[%s7394_s13 + $0x68] sm:$0xff] %v4533_v29 }
 0x379   : > { %v4519_v50 = vpop.permute.xlu1 %4518 }
 0x37a   : > { %v4534_v10 = vsel %vm4528_vm8, %v4517_v52, %v4519_v50  ;;  %4595 = vst.msk [vmem:[%s7394_s13 + $0x88] sm:$0xff] %vm4528_vm8, %v4519_v50 }
 0x37b   : > { %4594 = vst [vmem:[%s7394_s13 + $0x80] sm:$0xff] %v4534_v10 }
 0x37d   : > { %v4523_v11 = vpop.permute.xlu1 %4522 }
 0x37e   : > { %v4535_v49 = vsel %vm4528_vm8, %v4521_v22, %v4523_v11  ;;  %4598 = vst.msk [vmem:[%s7394_s13 + $0xa0] sm:$0xff] %vm4528_vm8, %v4523_v11 }
 0x37f   : > { %4597 = vst [vmem:[%s7394_s13 + $0x98] sm:$0xff] %v4535_v49 }
 0x381   : > { %v4527_v20 = vpop.permute.xlu1 %4526 }
 0x382   : > { %v4536_v23 = vsel %vm4528_vm8, %v4525_v27, %v4527_v20  ;;  %4601 = vst.msk [vmem:[%s7394_s13 + $0xb8] sm:$0xff] %vm4528_vm8, %v4527_v20 }
 0x383   : > { %4600 = vst [vmem:[%s7394_s13 + $0xb0] sm:$0xff] %v4536_v23 }
 0x384   : > { %4819 = shalt.err (!%p4816_p2)
}
 0x385   : > { %s4820_s25 = scalar_lea.hbm %s7490_s22, 3072  ;;  %s4824_s29 = scalar_lea.hbm %s7541_s1, 6144 }
 0x386   : > { %p4821_p4 = scmp.ne.s32.totalorder %s7490_s22, %s4820_s25  ;;  %p4825_p9 = scmp.lt.u32.totalorder %s7490_s22, %s7541_s1 }
 0x387   : > { %p4826_p1 = scmp.lt.u32.totalorder %s4824_s29, %s4820_s25  ;;  %p4828_p6 = scmp.lt.u32.totalorder %s4820_s25, %s7490_s22 }
 0x388   : > { %p4822_p5 = pnand %p4821_p4, %p8053_p11 }
 0x389   : > { %p4827_p3 = por %p4826_p1, %p4825_p9 }
 0x38a   : > { %p4823_p7 = pneg %p4822_p5 }
 0x38b   : > { %p4829_p12 = por %p4828_p6, %p4827_p3 }
 0x38d   : > { %p4830_p13 = pnand %p4829_p12, %p4823_p7 }
 0x38f   : > { %4833 = shalt.err (!%p4830_p13)
}
 0x390   : > { %s4890_s4 = smov 384   ;;  %s4891_s5 = smov 24  }
 0x391   : > { %4708 = dma.vmem_to_hbm [thread:$0]  (%p8053_p11), %s7492_s16, 3072, %s7490_s22, %s4603_s10, %s4890_s4, %s4890_s4, %s4891_s5  }
 0x392 PF: > { %s4632_s11 = sand.u32 1, %s4860_s6   ;;  %p8054_p8 = scmp.ne.s32.totalorder %s7711_s19, 0 }
 0x393   : > { %p8055_p10 = scmp.ge.s32.totalorder %s4872_s9, 2  ;;  %s4633_s13 = scalar_lea.sflag [#allocation4], %s4632_s11 }
 0x395   : > { %p4715_p0 = pnand %p8055_p10, %p8054_p8 }
 0x397   : > { %4855 = dma.done.wait (!%p4715_p0), %s4633_s13, 3072  }
 0x398   : > { %4857 = vsyncadd (!%p4715_p0), %s4633_s13, 4294964224  ;;  %p14_p2 = scmp.ge.s32.totalorder %s4927_s12, 4   ;;  %s8056_s6 = smov %s4864_s7 }
 0x399   : > { %s8057_s7 = smov %s4868_s8  ;;  %s8058_s8 = smov %s4939_s15 }
 0x39a   : > { %s8059_s9 = smov %s4927_s12  ;;  %16 = sbr.rel (!%p14_p2) target bundleno = 5 (0x5), region = 69 }
 0x3a1   :  { %4638 = vsyncpa [#allocation3], 1 }
 0x3a2   :  { %4640 = vsyncpa [#allocation3 + $0x1], 1 }
 0x3a3   :  { %4641 = vsyncpa [#allocation4], 1 }
 0x3a4   :  { %4643 = vsyncpa [#allocation4 + $0x1], 1 }

</bundles_post_ra>
